<compile_context>
chip_gen: v7x
topology: tpu7x:2x2x1
jax: 0.10.0
libtpu: 0.0.40
codegen_flags: <defaults>
</compile_context>

<pallas_src>
import functools

import jax
import jax.numpy as jnp
from jax.experimental import pallas as pl
from jax.experimental.pallas import tpu as pltpu


def _round_up(x, m):
    return (x + m - 1) // m * m


# ----------------------------------------------------------------------------
# Fused im2col-matmul + bias + (residual) + (ReLU) Pallas kernel
# ----------------------------------------------------------------------------
def _make_conv_kernel(relu: bool, has_res: bool):
    """acc(f32) += a(bf16) @ w(bf16);  epilogue: +bias (+res) (relu)."""

    def epilogue(acc, b_ref, r_ref, o_ref):
        out = acc + b_ref[...]
        if r_ref is not None:
            out = out + r_ref[...].astype(jnp.float32)
        if relu:
            out = jnp.maximum(out, 0.0)
        o_ref[...] = out.astype(o_ref.dtype)

    if has_res:
        def kernel(a_ref, w_ref, b_ref, r_ref, o_ref, acc_ref):
            k = pl.program_id(2)

            @pl.when(k == 0)
            def _():
                acc_ref[...] = jnp.zeros_like(acc_ref)

            acc_ref[...] += jnp.dot(a_ref[...], w_ref[...],
                                    preferred_element_type=jnp.float32)

            @pl.when(k == pl.num_programs(2) - 1)
            def _():
                epilogue(acc_ref[...], b_ref, r_ref, o_ref)
    else:
        def kernel(a_ref, w_ref, b_ref, o_ref, acc_ref):
            k = pl.program_id(2)

            @pl.when(k == 0)
            def _():
                acc_ref[...] = jnp.zeros_like(acc_ref)

            acc_ref[...] += jnp.dot(a_ref[...], w_ref[...],
                                    preferred_element_type=jnp.float32)

            @pl.when(k == pl.num_programs(2) - 1)
            def _():
                epilogue(acc_ref[...], b_ref, None, o_ref)

    return kernel


def _im2col(x_bf16, kh, kw, stride, padding, ho, wo):
    """(N,H,W,Cin) -> (N*Ho*Wo, KH*KW*Cin) bf16; tap-major / channel-minor
    ordering matches w.reshape(KH*KW*Cin, Cout)."""
    if padding > 0:
        x_bf16 = jnp.pad(x_bf16, ((0, 0), (padding, padding),
                                  (padding, padding), (0, 0)))
    n = x_bf16.shape[0]
    cin = x_bf16.shape[-1]
    cols = []
    for di in range(kh):
        for dj in range(kw):
            cols.append(x_bf16[:, di:di + (ho - 1) * stride + 1:stride,
                                  dj:dj + (wo - 1) * stride + 1:stride, :])
    # TODO(synk): this still materializes the KH*KW-fold im2col buffer in HBM;
    # removing it needs manual in-kernel DMA of shifted windows from the padded
    # NHWC tensor (memory_space=pl.ANY + make_async_copy), not a BlockSpec.
    a = cols[0] if len(cols) == 1 else jnp.concatenate(cols, axis=-1)
    return a.reshape(n * ho * wo, kh * kw * cin)


def conv2d_bn_act(x, w, bias, *, stride=1, padding=1,
                  residual=None, relu=True, out_dtype=jnp.float32):
    """x: (N,H,W,Cin) NHWC; w: (KH,KW,Cin,Cout) bf16, BN scale pre-folded;
    bias: (1,Cout) f32.  Computes relu?( conv(x, w) + bias (+ residual) )."""
    N, H, W, Cin = x.shape
    KH, KW, _, Cout = w.shape
    Ho = (H + 2 * padding - KH) // stride + 1
    Wo = (W + 2 * padding - KW) // stride + 1
    M = N * Ho * Wo
    K = KH * KW * Cin

    a = _im2col(x.astype(jnp.bfloat16), KH, KW, stride, padding, Ho, Wo)
    wm = w.astype(jnp.bfloat16).reshape(K, Cout)

    # K-axis tiling: keep the whole contraction in one MXU pass when it fits
    # comfortably in VMEM; otherwise tile by 2048 and zero-pad (zeros add
    # nothing to the accumulation).
    if K <= 2048:
        tk, Kp = K, K
    else:
        tk = 2048
        Kp = _round_up(K, tk)
        a = jnp.pad(a, ((0, 0), (0, Kp - K)))
        wm = jnp.pad(wm, ((0, Kp - K), (0, 0)))
    nk = Kp // tk

    # Lane (N) tile: 256 when channels allow (v6e/v7x MXU is 2x256^2), else the
    # native 128, else full extent for tiny channel counts.
    if Cout % 256 == 0:
        tn = 256
    elif Cout % 128 == 0:
        tn = 128
    else:
        tn = Cout
    # Sublane (M) tile: large tiles approach the HBM roofline (512 ~ 85%).
    tm = M if M <= 512 else 512
    m_tiles = pl.cdiv(M, tm)
    n_tiles = pl.cdiv(Cout, tn)
    # Give both TensorCores (v7x megacore) at least one parallel tile.
    if m_tiles * n_tiles == 1 and M >= 16:
        tm = max(8, _round_up(pl.cdiv(M, 2), 8))
        m_tiles = pl.cdiv(M, tm)

    has_res = residual is not None
    in_specs = [
        pl.BlockSpec((tm, tk), lambda i, j, k: (i, k)),    # im2col activations
        pl.BlockSpec((tk, tn), lambda i, j, k: (k, j)),    # scale-folded weights
        pl.BlockSpec((1, tn), lambda i, j, k: (0, j)),     # folded BN bias
    ]
    args = [a, wm, bias]
    if has_res:
        r2 = residual.astype(jnp.bfloat16).reshape(M, Cout)   # bf16 residual DMA
        in_specs.append(pl.BlockSpec((tm, tn), lambda i, j, k: (i, j)))
        args.append(r2)

    out_bytes = M * Cout * jnp.dtype(out_dtype).itemsize
    bytes_accessed = (a.size * 2 + wm.size * 2 + bias.size * 4 + out_bytes
                      + (M * Cout * 2 if has_res else 0))

    out = pl.pallas_call(
        _make_conv_kernel(relu, has_res),
        out_shape=jax.ShapeDtypeStruct((M, Cout), out_dtype),
        grid=(m_tiles, n_tiles, nk),
        in_specs=in_specs,
        out_specs=pl.BlockSpec((tm, tn), lambda i, j, k: (i, j)),
        scratch_shapes=[pltpu.VMEM((tm, tn), jnp.float32)],
        compiler_params=pltpu.CompilerParams(
            dimension_semantics=("parallel", "parallel", "arbitrary"),
            vmem_limit_bytes=32 * 1024 * 1024),
        cost_estimate=pl.CostEstimate(
            flops=2 * M * Cout * Kp,
            transcendentals=0,
            bytes_accessed=bytes_accessed),
    )(*args)
    return out.reshape(N, Ho, Wo, Cout)


# ----------------------------------------------------------------------------
# BasicBlock2 parameters (eval-mode BN folded: scale into weights, bias kept)
# ----------------------------------------------------------------------------
_BN_EPS = 1e-5


def _fold_bn(gamma, beta, running_mean, running_var):
    scale = gamma / jnp.sqrt(running_var + _BN_EPS)
    bias = beta - running_mean * scale
    return scale.astype(jnp.float32), bias.astype(jnp.float32)


def _kaiming_conv(key, kh, kw, cin, cout):
    fan_out = cout * kh * kw
    std = (2.0 / fan_out) ** 0.5
    return jax.random.normal(key, (kh, kw, cin, cout), jnp.float32) * std


def init_basic_block2(key, inplanes, planes, stride=1):
    """BN scale is folded into the bf16 conv weights at init; bias stays f32.
    NOTE: `stride` is NOT stored in the param pytree (it must stay a static
    Python int — the previous version traced it and crashed on slicing)."""
    k1, k2, k3 = jax.random.split(key, 3)
    p = {}
    s1, b1 = _fold_bn(jnp.ones(planes), jnp.zeros(planes),
                      jnp.zeros(planes), jnp.ones(planes))
    p['conv1_w'] = (_kaiming_conv(k1, 3, 3, inplanes, planes)
                    * s1).astype(jnp.bfloat16)
    p['bn1_b'] = b1.reshape(1, planes)
    s2, b2 = _fold_bn(jnp.ones(planes), jnp.zeros(planes),
                      jnp.zeros(planes), jnp.ones(planes))
    p['conv2_w'] = (_kaiming_conv(k2, 3, 3, planes, planes)
                    * s2).astype(jnp.bfloat16)
    p['bn2_b'] = b2.reshape(1, planes)
    if stride != 1 or inplanes != planes:          # BasicBlock2.expansion == 1
        sd, bd = _fold_bn(jnp.ones(planes), jnp.zeros(planes),
                          jnp.zeros(planes), jnp.ones(planes))
        p['down_w'] = (_kaiming_conv(k3, 1, 1, inplanes, planes)
                       * sd).astype(jnp.bfloat16)
        p['dbn_b'] = bd.reshape(1, planes)
    return p


def basic_block2_forward(p, x_nhwc, *, stride):
    """BasicBlock2.forward (num_segments / remainder are stored by the module
    but never used in its forward).  conv1/downsample outputs stay bf16."""
    out = conv2d_bn_act(x_nhwc, p['conv1_w'], p['bn1_b'],
                        stride=stride, padding=1, relu=True,
                        out_dtype=jnp.bfloat16)
    if 'down_w' in p:
        identity = conv2d_bn_act(x_nhwc, p['down_w'], p['dbn_b'],
                                 stride=stride, padding=0, relu=False,
                                 out_dtype=jnp.bfloat16)
    else:
        identity = x_nhwc
    # conv2 -> bn2 -> (+identity) -> relu fused into a single pallas_call
    out = conv2d_bn_act(out, p['conv2_w'], p['bn2_b'],
                        stride=1, padding=1, residual=identity, relu=True,
                        out_dtype=jnp.float32)
    return out


# ----------------------------------------------------------------------------
# Pure-JAX reference (f32, HIGHEST precision) for correctness checking
# ----------------------------------------------------------------------------
def _ref_conv(x, w, stride, padding):
    return jax.lax.conv_general_dilated(
        x.astype(jnp.float32), w.astype(jnp.float32), (stride, stride),
        [(padding, padding), (padding, padding)],
        dimension_numbers=('NHWC', 'HWIO', 'NHWC'),
        precision=jax.lax.Precision.HIGHEST)


def basic_block2_reference(p, x_nhwc, *, stride):
    out = jax.nn.relu(_ref_conv(x_nhwc, p['conv1_w'], stride, 1) + p['bn1_b'])
    identity = x_nhwc
    if 'down_w' in p:
        identity = _ref_conv(x_nhwc, p['down_w'], stride, 0) + p['dbn_b']
    out = _ref_conv(out, p['conv2_w'], 1, 1) + p['bn2_b'] + identity
    return jax.nn.relu(out)


if __name__ == "__main__":
    # BasicBlock2(inplanes=64, planes=128, num_segments=4, stride=2,
    #             downsample=conv1x1+BN), eval mode with fresh BN running stats.
    N, H, W = 2, 16, 16
    inplanes, planes, stride = 64, 128, 2
    num_segments = 4                      # unused by BasicBlock2.forward

    key = jax.random.PRNGKey(0)
    kx, kp = jax.random.split(key)
    x_nchw = jax.random.normal(kx, (N, inplanes, H, W), jnp.float32)  # NCHW
    x_nhwc = jnp.transpose(x_nchw, (0, 2, 3, 1))                      # -> NHWC

    params = init_basic_block2(kp, inplanes, planes, stride=stride)

    # stride baked in statically (not part of the traced pytree)
    fwd = jax.jit(functools.partial(basic_block2_forward, stride=stride))
    out_nhwc = jax.block_until_ready(fwd(params, x_nhwc))
    out = jnp.transpose(out_nhwc, (0, 3, 1, 2))       # back to NCHW like PyTorch

    Ho = (H + 2 - 3) // stride + 1
    assert out.shape == (N, planes, Ho, Ho), out.shape
    assert bool(jnp.all(jnp.isfinite(out)))

    ref = jnp.transpose(
        basic_block2_reference(params, x_nhwc, stride=stride), (0, 3, 1, 2))
    err = float(jnp.max(jnp.abs(out - ref)))
    assert err < 0.1, f"max abs err {err}"
    print("KERNEL_OK")
</pallas_src>

<mosaic_0001>
module attributes {stable_mosaic.version = 11 : i64} {
  func.func @kernel(%arg0: i32, %arg1: i32, %arg2: i32, %arg3: memref<64x64xbf16, #tpu.memory_space<vmem>>, %arg4: memref<64x128xbf16, #tpu.memory_space<vmem>>, %arg5: memref<1x128xf32, #tpu.memory_space<vmem>>, %arg6: memref<64x128xbf16, #tpu.memory_space<vmem>>, %arg7: memref<64x128xf32, #tpu.memory_space<vmem>>) attributes {dimension_semantics = [#tpu.dimension_semantics<parallel>, #tpu.dimension_semantics<parallel>, #tpu.dimension_semantics<arbitrary>], iteration_bounds = array<i64: 2, 1, 1>, scalar_prefetch = 0 : i64, scratch_operands = 1 : i64, tpu.core_type = #tpu.core_type<tc>, window_params = [{transform_indices = @transform_0, window_bounds = array<i64: 64, 64>}, {transform_indices = @transform_1, window_bounds = array<i64: 64, 128>}, {transform_indices = @transform_2, window_bounds = array<i64: 1, 128>}, {transform_indices = @transform_3, window_bounds = array<i64: 64, 128>}]} {
    %c0_i32 = arith.constant 0 : i32
    %0 = arith.cmpi eq, %arg2, %c0_i32 : i32
    %1 = arith.extui %0 : i1 to i32
    %c0_i32_0 = arith.constant 0 : i32
    %2 = arith.cmpi ne, %1, %c0_i32_0 : i32
    scf.if %2 {
      %cst_10 = arith.constant 0.000000e+00 : f32
      %12 = vector.broadcast %cst_10 : f32 to vector<64x128xf32>
      %c0_11 = arith.constant 0 : index
      %c0_12 = arith.constant 0 : index
      %13 = vector.load %arg7[%c0_11, %c0_12] : memref<64x128xf32, #tpu.memory_space<vmem>>, vector<64x128xf32>
      tpu.vector_store %arg7[%c0_11, %c0_12], %12 {strides = array<i32>} : memref<64x128xf32, #tpu.memory_space<vmem>>, vector<64x128xf32>,
    } else {
    }
    %c0 = arith.constant 0 : index
    %c0_1 = arith.constant 0 : index
    %3 = vector.load %arg7[%c0, %c0_1] : memref<64x128xf32, #tpu.memory_space<vmem>>, vector<64x128xf32>
    %c0_2 = arith.constant 0 : index
    %c0_3 = arith.constant 0 : index
    %4 = vector.load %arg3[%c0_2, %c0_3] : memref<64x64xbf16, #tpu.memory_space<vmem>>, vector<64x64xbf16>
    %c0_4 = arith.constant 0 : index
    %c0_5 = arith.constant 0 : index
    %5 = vector.load %arg4[%c0_4, %c0_5] : memref<64x128xbf16, #tpu.memory_space<vmem>>, vector<64x128xbf16>
    %cst = arith.constant dense<0.000000e+00> : vector<64x128xf32>
    %6 = tpu.matmul %4, %5, %cst {dimension_numbers = #tpu.dot_dimension_numbers<[1], [0], [0], [1], [0, 0, 1, 1], [], []>} : vector<64x64xbf16>, vector<64x128xbf16>, vector<64x128xf32> -> vector<64x128xf32>
    %7 = arith.addf %3, %6 : vector<64x128xf32>
    %c0_6 = arith.constant 0 : index
    %c0_7 = arith.constant 0 : index
    %8 = vector.load %arg7[%c0_6, %c0_7] : memref<64x128xf32, #tpu.memory_space<vmem>>, vector<64x128xf32>
    tpu.vector_store %arg7[%c0_6, %c0_7], %7 {strides = array<i32>} : memref<64x128xf32, #tpu.memory_space<vmem>>, vector<64x128xf32>,
    %c0_i32_8 = arith.constant 0 : i32
    %9 = arith.cmpi eq, %arg2, %c0_i32_8 : i32
    %10 = arith.extui %9 : i1 to i32
    %c0_i32_9 = arith.constant 0 : i32
    %11 = arith.cmpi ne, %10, %c0_i32_9 : i32
    scf.if %11 {
      %c0_10 = arith.constant 0 : index
      %c0_11 = arith.constant 0 : index
      %12 = vector.load %arg7[%c0_10, %c0_11] : memref<64x128xf32, #tpu.memory_space<vmem>>, vector<64x128xf32>
      %c0_12 = arith.constant 0 : index
      %c0_13 = arith.constant 0 : index
      %13 = vector.load %arg5[%c0_12, %c0_13] : memref<1x128xf32, #tpu.memory_space<vmem>>, vector<1x128xf32>
      %14 = vector.broadcast %13 : vector<1x128xf32> to vector<64x128xf32>
      %15 = arith.addf %12, %14 : vector<64x128xf32>
      %16 = arith.truncf %15 : vector<64x128xf32> to vector<64x128xbf16>
      %c0_14 = arith.constant 0 : index
      %c0_15 = arith.constant 0 : index
      %17 = vector.load %arg6[%c0_14, %c0_15] : memref<64x128xbf16, #tpu.memory_space<vmem>>, vector<64x128xbf16>
      tpu.vector_store %arg6[%c0_14, %c0_15], %16 {strides = array<i32>} : memref<64x128xbf16, #tpu.memory_space<vmem>>, vector<64x128xbf16>,
    } else {
    }
    return
  }
  func.func @transform_0(%arg0: i32, %arg1: i32, %arg2: i32) -> (i32, i32) {
    %c0_i32 = arith.constant 0 : i32
    return %arg0, %arg2 : i32, i32
  }
  func.func @transform_1(%arg0: i32, %arg1: i32, %arg2: i32) -> (i32, i32) {
    %c0_i32 = arith.constant 0 : i32
    return %arg2, %arg1 : i32, i32
  }
  func.func @transform_2(%arg0: i32, %arg1: i32, %arg2: i32) -> (i32, i32) {
    %c0_i32 = arith.constant 0 : i32
    %c0_i32_0 = arith.constant 0 : i32
    return %c0_i32, %arg1 : i32, i32
  }
  func.func @transform_3(%arg0: i32, %arg1: i32, %arg2: i32) -> (i32, i32) {
    %c0_i32 = arith.constant 0 : i32
    return %arg0, %arg1 : i32, i32
  }
}

module attributes {stable_mosaic.version = 11 : i64} {
  func.func @kernel(%arg0: i32, %arg1: i32, %arg2: i32, %arg3: memref<64x576xbf16, #tpu.memory_space<vmem>>, %arg4: memref<576x128xbf16, #tpu.memory_space<vmem>>, %arg5: memref<1x128xf32, #tpu.memory_space<vmem>>, %arg6: memref<64x128xbf16, #tpu.memory_space<vmem>>, %arg7: memref<64x128xf32, #tpu.memory_space<vmem>>) attributes {dimension_semantics = [#tpu.dimension_semantics<parallel>, #tpu.dimension_semantics<parallel>, #tpu.dimension_semantics<arbitrary>], iteration_bounds = array<i64: 2, 1, 1>, scalar_prefetch = 0 : i64, scratch_operands = 1 : i64, tpu.core_type = #tpu.core_type<tc>, window_params = [{transform_indices = @transform_0, window_bounds = array<i64: 64, 576>}, {transform_indices = @transform_1, window_bounds = array<i64: 576, 128>}, {transform_indices = @transform_2, window_bounds = array<i64: 1, 128>}, {transform_indices = @transform_3, window_bounds = array<i64: 64, 128>}]} {
    %c0_i32 = arith.constant 0 : i32
    %0 = arith.cmpi eq, %arg2, %c0_i32 : i32
    %1 = arith.extui %0 : i1 to i32
    %c0_i32_0 = arith.constant 0 : i32
    %2 = arith.cmpi ne, %1, %c0_i32_0 : i32
    scf.if %2 {
      %cst_10 = arith.constant 0.000000e+00 : f32
      %12 = vector.broadcast %cst_10 : f32 to vector<64x128xf32>
      %c0_11 = arith.constant 0 : index
      %c0_12 = arith.constant 0 : index
      %13 = vector.load %arg7[%c0_11, %c0_12] : memref<64x128xf32, #tpu.memory_space<vmem>>, vector<64x128xf32>
      tpu.vector_store %arg7[%c0_11, %c0_12], %12 {strides = array<i32>} : memref<64x128xf32, #tpu.memory_space<vmem>>, vector<64x128xf32>,
    } else {
    }
    %c0 = arith.constant 0 : index
    %c0_1 = arith.constant 0 : index
    %3 = vector.load %arg7[%c0, %c0_1] : memref<64x128xf32, #tpu.memory_space<vmem>>, vector<64x128xf32>
    %c0_2 = arith.constant 0 : index
    %c0_3 = arith.constant 0 : index
    %4 = vector.load %arg3[%c0_2, %c0_3] : memref<64x576xbf16, #tpu.memory_space<vmem>>, vector<64x576xbf16>
    %c0_4 = arith.constant 0 : index
    %c0_5 = arith.constant 0 : index
    %5 = vector.load %arg4[%c0_4, %c0_5] : memref<576x128xbf16, #tpu.memory_space<vmem>>, vector<576x128xbf16>
    %cst = arith.constant dense<0.000000e+00> : vector<64x128xf32>
    %6 = tpu.matmul %4, %5, %cst {dimension_numbers = #tpu.dot_dimension_numbers<[1], [0], [0], [1], [0, 0, 1, 1], [], []>} : vector<64x576xbf16>, vector<576x128xbf16>, vector<64x128xf32> -> vector<64x128xf32>
    %7 = arith.addf %3, %6 : vector<64x128xf32>
    %c0_6 = arith.constant 0 : index
    %c0_7 = arith.constant 0 : index
    %8 = vector.load %arg7[%c0_6, %c0_7] : memref<64x128xf32, #tpu.memory_space<vmem>>, vector<64x128xf32>
    tpu.vector_store %arg7[%c0_6, %c0_7], %7 {strides = array<i32>} : memref<64x128xf32, #tpu.memory_space<vmem>>, vector<64x128xf32>,
    %c0_i32_8 = arith.constant 0 : i32
    %9 = arith.cmpi eq, %arg2, %c0_i32_8 : i32
    %10 = arith.extui %9 : i1 to i32
    %c0_i32_9 = arith.constant 0 : i32
    %11 = arith.cmpi ne, %10, %c0_i32_9 : i32
    scf.if %11 {
      %c0_10 = arith.constant 0 : index
      %c0_11 = arith.constant 0 : index
      %12 = vector.load %arg7[%c0_10, %c0_11] : memref<64x128xf32, #tpu.memory_space<vmem>>, vector<64x128xf32>
      %c0_12 = arith.constant 0 : index
      %c0_13 = arith.constant 0 : index
      %13 = vector.load %arg5[%c0_12, %c0_13] : memref<1x128xf32, #tpu.memory_space<vmem>>, vector<1x128xf32>
      %14 = vector.broadcast %13 : vector<1x128xf32> to vector<64x128xf32>
      %15 = arith.addf %12, %14 : vector<64x128xf32>
      %cst_14 = arith.constant 0.000000e+00 : f32
      %16 = vector.broadcast %cst_14 : f32 to vector<64x128xf32>
      %17 = arith.maximumf %15, %16 : vector<64x128xf32>
      %18 = arith.truncf %17 : vector<64x128xf32> to vector<64x128xbf16>
      %c0_15 = arith.constant 0 : index
      %c0_16 = arith.constant 0 : index
      %19 = vector.load %arg6[%c0_15, %c0_16] : memref<64x128xbf16, #tpu.memory_space<vmem>>, vector<64x128xbf16>
      tpu.vector_store %arg6[%c0_15, %c0_16], %18 {strides = array<i32>} : memref<64x128xbf16, #tpu.memory_space<vmem>>, vector<64x128xbf16>,
    } else {
    }
    return
  }
  func.func @transform_0(%arg0: i32, %arg1: i32, %arg2: i32) -> (i32, i32) {
    %c0_i32 = arith.constant 0 : i32
    return %arg0, %arg2 : i32, i32
  }
  func.func @transform_1(%arg0: i32, %arg1: i32, %arg2: i32) -> (i32, i32) {
    %c0_i32 = arith.constant 0 : i32
    return %arg2, %arg1 : i32, i32
  }
  func.func @transform_2(%arg0: i32, %arg1: i32, %arg2: i32) -> (i32, i32) {
    %c0_i32 = arith.constant 0 : i32
    %c0_i32_0 = arith.constant 0 : i32
    return %c0_i32, %arg1 : i32, i32
  }
  func.func @transform_3(%arg0: i32, %arg1: i32, %arg2: i32) -> (i32, i32) {
    %c0_i32 = arith.constant 0 : i32
    return %arg0, %arg1 : i32, i32
  }
}

module attributes {stable_mosaic.version = 11 : i64} {
  func.func @kernel(%arg0: i32, %arg1: i32, %arg2: i32, %arg3: memref<64x1152xbf16, #tpu.memory_space<vmem>>, %arg4: memref<1152x128xbf16, #tpu.memory_space<vmem>>, %arg5: memref<1x128xf32, #tpu.memory_space<vmem>>, %arg6: memref<64x128xbf16, #tpu.memory_space<vmem>>, %arg7: memref<64x128xf32, #tpu.memory_space<vmem>>, %arg8: memref<64x128xf32, #tpu.memory_space<vmem>>) attributes {dimension_semantics = [#tpu.dimension_semantics<parallel>, #tpu.dimension_semantics<parallel>, #tpu.dimension_semantics<arbitrary>], iteration_bounds = array<i64: 2, 1, 1>, scalar_prefetch = 0 : i64, scratch_operands = 1 : i64, tpu.core_type = #tpu.core_type<tc>, window_params = [{transform_indices = @transform_0, window_bounds = array<i64: 64, 1152>}, {transform_indices = @transform_1, window_bounds = array<i64: 1152, 128>}, {transform_indices = @transform_2, window_bounds = array<i64: 1, 128>}, {transform_indices = @transform_3, window_bounds = array<i64: 64, 128>}, {transform_indices = @transform_4, window_bounds = array<i64: 64, 128>}]} {
    %c0_i32 = arith.constant 0 : i32
    %0 = arith.cmpi eq, %arg2, %c0_i32 : i32
    %1 = arith.extui %0 : i1 to i32
    %c0_i32_0 = arith.constant 0 : i32
    %2 = arith.cmpi ne, %1, %c0_i32_0 : i32
    scf.if %2 {
      %cst_10 = arith.constant 0.000000e+00 : f32
      %12 = vector.broadcast %cst_10 : f32 to vector<64x128xf32>
      %c0_11 = arith.constant 0 : index
      %c0_12 = arith.constant 0 : index
      %13 = vector.load %arg8[%c0_11, %c0_12] : memref<64x128xf32, #tpu.memory_space<vmem>>, vector<64x128xf32>
      tpu.vector_store %arg8[%c0_11, %c0_12], %12 {strides = array<i32>} : memref<64x128xf32, #tpu.memory_space<vmem>>, vector<64x128xf32>,
    } else {
    }
    %c0 = arith.constant 0 : index
    %c0_1 = arith.constant 0 : index
    %3 = vector.load %arg8[%c0, %c0_1] : memref<64x128xf32, #tpu.memory_space<vmem>>, vector<64x128xf32>
    %c0_2 = arith.constant 0 : index
    %c0_3 = arith.constant 0 : index
    %4 = vector.load %arg3[%c0_2, %c0_3] : memref<64x1152xbf16, #tpu.memory_space<vmem>>, vector<64x1152xbf16>
    %c0_4 = arith.constant 0 : index
    %c0_5 = arith.constant 0 : index
    %5 = vector.load %arg4[%c0_4, %c0_5] : memref<1152x128xbf16, #tpu.memory_space<vmem>>, vector<1152x128xbf16>
    %cst = arith.constant dense<0.000000e+00> : vector<64x128xf32>
    %6 = tpu.matmul %4, %5, %cst {dimension_numbers = #tpu.dot_dimension_numbers<[1], [0], [0], [1], [0, 0, 1, 1], [], []>} : vector<64x1152xbf16>, vector<1152x128xbf16>, vector<64x128xf32> -> vector<64x128xf32>
    %7 = arith.addf %3, %6 : vector<64x128xf32>
    %c0_6 = arith.constant 0 : index
    %c0_7 = arith.constant 0 : index
    %8 = vector.load %arg8[%c0_6, %c0_7] : memref<64x128xf32, #tpu.memory_space<vmem>>, vector<64x128xf32>
    tpu.vector_store %arg8[%c0_6, %c0_7], %7 {strides = array<i32>} : memref<64x128xf32, #tpu.memory_space<vmem>>, vector<64x128xf32>,
    %c0_i32_8 = arith.constant 0 : i32
    %9 = arith.cmpi eq, %arg2, %c0_i32_8 : i32
    %10 = arith.extui %9 : i1 to i32
    %c0_i32_9 = arith.constant 0 : i32
    %11 = arith.cmpi ne, %10, %c0_i32_9 : i32
    scf.if %11 {
      %c0_10 = arith.constant 0 : index
      %c0_11 = arith.constant 0 : index
      %12 = vector.load %arg8[%c0_10, %c0_11] : memref<64x128xf32, #tpu.memory_space<vmem>>, vector<64x128xf32>
      %c0_12 = arith.constant 0 : index
      %c0_13 = arith.constant 0 : index
      %13 = vector.load %arg5[%c0_12, %c0_13] : memref<1x128xf32, #tpu.memory_space<vmem>>, vector<1x128xf32>
      %14 = vector.broadcast %13 : vector<1x128xf32> to vector<64x128xf32>
      %15 = arith.addf %12, %14 : vector<64x128xf32>
      %c0_14 = arith.constant 0 : index
      %c0_15 = arith.constant 0 : index
      %16 = vector.load %arg6[%c0_14, %c0_15] : memref<64x128xbf16, #tpu.memory_space<vmem>>, vector<64x128xbf16>
      %17 = arith.extf %16 : vector<64x128xbf16> to vector<64x128xf32>
      %18 = arith.addf %15, %17 : vector<64x128xf32>
      %cst_16 = arith.constant 0.000000e+00 : f32
      %19 = vector.broadcast %cst_16 : f32 to vector<64x128xf32>
      %20 = arith.maximumf %18, %19 : vector<64x128xf32>
      %c0_17 = arith.constant 0 : index
      %c0_18 = arith.constant 0 : index
      %21 = vector.load %arg7[%c0_17, %c0_18] : memref<64x128xf32, #tpu.memory_space<vmem>>, vector<64x128xf32>
      tpu.vector_store %arg7[%c0_17, %c0_18], %20 {strides = array<i32>} : memref<64x128xf32, #tpu.memory_space<vmem>>, vector<64x128xf32>,
    } else {
    }
    return
  }
  func.func @transform_0(%arg0: i32, %arg1: i32, %arg2: i32) -> (i32, i32) {
    %c0_i32 = arith.constant 0 : i32
    return %arg0, %arg2 : i32, i32
  }
  func.func @transform_1(%arg0: i32, %arg1: i32, %arg2: i32) -> (i32, i32) {
    %c0_i32 = arith.constant 0 : i32
    return %arg2, %arg1 : i32, i32
  }
  func.func @transform_2(%arg0: i32, %arg1: i32, %arg2: i32) -> (i32, i32) {
    %c0_i32 = arith.constant 0 : i32
    %c0_i32_0 = arith.constant 0 : i32
    return %c0_i32, %arg1 : i32, i32
  }
  func.func @transform_3(%arg0: i32, %arg1: i32, %arg2: i32) -> (i32, i32) {
    %c0_i32 = arith.constant 0 : i32
    return %arg0, %arg1 : i32, i32
  }
  func.func @transform_4(%arg0: i32, %arg1: i32, %arg2: i32) -> (i32, i32) {
    %c0_i32 = arith.constant 0 : i32
    return %arg0, %arg1 : i32, i32
  }
}

</mosaic_0001>

<bundles_post_ra>
// kernel: basic_block2_forward.4
= control target key start
LH: loop header
LB: loop body
LE: loop exit
PB: predicated region body
PF: predicated region fallthrough
CT: control target
= control target key end

     0   :  { %s784_s12 = smov 0   ;;  %s786_s13 = smov 0   ;;  %s843_s0 = inlined_call_operand.vmem [shape: bf16[128,64], index: 0, kind: input, shape index: {}]   ;;  %s844_s1 = inlined_call_operand.vmem [shape: bf16[64,128], index: 1, kind: input, shape index: {}]   ;;  %s845_s2 = inlined_call_operand.vmem [shape: f32[1,128], index: 2, kind: input, shape index: {}]   ;;  %s846_s3 = inlined_call_operand.vmem [shape: bf16[128,128], index: 3, kind: output, shape index: {}]  }
   0x1   :  { %s788_s14 = smov 0  }
   0x2 LB: > { %s32_s15 = sadd.s32 1, %s758_s13  ;;  %p617_p0 = scmp.ge.s32.totalorder %s762_s14, 1  ;;  %s762_s14 = sphi %s788_s14, %s13_s14   ;;  %s758_s13 = sphi %s786_s13, %s848_s13   ;;  %s754_s12 = sphi %s784_s12, %s847_s12  }
   0x3   : > { %p34_p1 = scmp.ge.s32.totalorder %s32_s15, 2  ;;  %p188_p2 = scmp.lt.s32.totalorder %s762_s14, 3 }
   0x5   : > { %s850_s15 = smov (%p34_p1, %s32_s15), 0  ;;  %p189_p3 = pnand %p617_p0, %p188_p2 }
   0x6   : > { %v732_v0 = vld [vmem:[%s844_s1] sm:$0xff] (!%p189_p3)   ;;  %s618_s18 = sshll.u32 (!%p189_p3), %s754_s12, 3  ;;  %v733_v1 = vld [vmem:[%s844_s1 + $0x8] sm:$0xff] (!%p189_p3)   ;;  %v734_v2 = vld [vmem:[%s844_s1 + $0x10] sm:$0xff] (!%p189_p3)   ;;  %vm340_vm0 = vcmask (!%p189_p3), 523264  }
   0x7   : > { %192 = sbr.rel (%p189_p3) target bundleno = 243 (0xf3), region = 32  ;;  %p230_p4 = scmp.lt.s32.totalorder (!%p189_p3), %s618_s18, 15  ;;  %684 = vmatprep.subr.bf16.mxu0 (!%p189_p3), %v732_v0  ;;  %700 = vmatprep.subr.bf16.mxu1 (!%p189_p3), %v732_v0  ;;  %v735_v3 = vld [vmem:[%s844_s1 + $0x18] sm:$0xff] (!%p189_p3)   ;;  %v634_v9 = vld [vmem:[%s845_s2] ss:$0 sm:$0xff] (!%p189_p3) }
   0x8   : > { %685 = vmatpush3.bf16.msra.mxu0 (!%p189_p3), %v732_v0  ;;  %704 = vmatpush3.bf16.msra.mxu1 (!%p189_p3), %v732_v0 }
   0x9   : > { %686 = vmatprep.subr.bf16.mxu0 (!%p189_p3), %v733_v1  ;;  %701 = vmatprep.subr.bf16.mxu1 (!%p189_p3), %v733_v1 }
   0xc   : > { %687 = vmatpush3.bf16.msra.mxu0 (!%p189_p3), %v733_v1  ;;  %705 = vmatpush3.bf16.msra.mxu1 (!%p189_p3), %v733_v1 }
   0xd   : > { %688 = vmatprep.subr.bf16.mxu0 (!%p189_p3), %v734_v2  ;;  %702 = vmatprep.subr.bf16.mxu1 (!%p189_p3), %v734_v2 }
   0xe   : > { %s852_s18 = smov (!%p230_p4, %s618_s18), 15 }
   0xf   : > { %s619_s23 = sshll.u32 %s852_s18, 2 }
  0x10   : > { %s236_s28 = scalar_lea.vmem %s843_s0, %s619_s23  ;;  %689 = vmatpush3.bf16.msra.mxu0 %v734_v2  ;;  %706 = vmatpush3.bf16.msra.mxu1 %v734_v2  ;;  %s257_s6 = scalar_lea.vmem %s846_s3, %s619_s23 }
  0x11   : > { %v736_v4 = vld [vmem:[%s236_s28] sm:$0xff]   ;;  %v737_v5 = vld [vmem:[%s236_s28 + $0x10] sm:$0xff]   ;;  %690 = vmatprep.subr.bf16.mxu0 %v735_v3  ;;  %703 = vmatprep.subr.bf16.mxu1 %v735_v3  ;;  %v738_v6 = vld [vmem:[%s236_s28 + $0x8] sm:$0xff]  }
  0x12   : > { %692 = vmatprep.mubr.msk.bf16.mxu0 %vm340_vm0, %v736_v4  ;;  %696 = vmatprep.mubr.msk.bf16.mxu1 %vm340_vm0, %v737_v5  ;;  %v739_v7 = vld [vmem:[%s236_s28 + $0x18] sm:$0xff]  }
  0x14   : > { %691 = vmatpush3.bf16.msra.mxu0 %v735_v3  ;;  %707 = vmatpush3.bf16.msra.mxu1 %v735_v3 }
  0x17   : > { %693 = vmatmul.mubr.msk.bf16.vlgmr.msra.gmra.mrb[0].mxu0 %vm340_vm0, %v738_v6  ;;  %697 = vmatmul.mubr.msk.bf16.vlgmr.msra.gmra.mrb[0].mxu1 %vm340_vm0, %v739_v7 }
  0xea   : > { %v694_v8 = vpop.f32.mrb[0].mxu0  ;;  %v698_v10 = vpop.f32.mrb[0].mxu1 }
  0xeb   : > { %v387_v11 = vpop.f32.mrb[1].mxu0  ;;  %v403_v12 = vpop.f32.mrb[1].mxu1  ;;  %v454_v15 = vadd.f32 %v694_v8, %v634_v9  ;;  %v458_v16 = vadd.f32 %v698_v10, %v634_v9 }
  0xec   : > { %v695_v13 = vpop.f32.mrb[2].mxu0  ;;  %v699_v14 = vpop.f32.mrb[2].mxu1  ;;  %v452_v21 = vadd.f32 %v634_v9, %v387_v11  ;;  %v456_v22 = vadd.f32 %v634_v9, %v403_v12 }
  0xed   : > { %v455_v17 = vadd.f32 %v695_v13, %v634_v9  ;;  %v459_v18 = vadd.f32 %v699_v14, %v634_v9  ;;  %v390_v19 = vpop.f32.mrb[3].mxu0  ;;  %v406_v20 = vpop.f32.mrb[3].mxu1 }
  0xee   : > { %v453_v23 = vadd.f32 %v634_v9, %v390_v19  ;;  %v457_v24 = vadd.f32 %v634_v9, %v406_v20 }
  0xef   : > { %v661_v25 = vpack.c.bf16 %v455_v17, %v454_v15  ;;  %v671_v26 = vpack.c.bf16 %v459_v18, %v458_v16 }
  0xf0   : > { %v656_v27 = vpack.c.bf16 %v453_v23, %v452_v21  ;;  %v666_v28 = vpack.c.bf16 %v457_v24, %v456_v22 }
  0xf1   : > { %673 = vst [vmem:[%s257_s6 + $0x8] sm:$0xff] %v661_v25   ;;  %675 = vst [vmem:[%s257_s6 + $0x18] sm:$0xff] %v671_v26  }
  0xf2   : > { %657 = vst [vmem:[%s257_s6] sm:$0xff] %v656_v27   ;;  %674 = vst [vmem:[%s257_s6 + $0x10] sm:$0xff] %v666_v28  }
  0xf3 PF: > { %s13_s14 = sadd.s32 1, %s762_s14   ;;  %s847_s12 = smov %s758_s13 }
  0xf4   : > { %p10_p5 = scmp.ge.s32.totalorder %s13_s14, 4   ;;  %s848_s13 = smov %s850_s15 }
  0xf6   :  { %12 = sbr.rel (!%p10_p5) target bundleno = 2 (0x2), region = 76 }

// kernel: basic_block2_forward.3
= control target key start
LH: loop header
LB: loop body
LE: loop exit
PB: predicated region body
PF: predicated region fallthrough
CT: control target
= control target key end

     0   :  { %s1470_s12 = smov 0   ;;  %s1472_s13 = smov 0   ;;  %s1643_s0 = inlined_call_operand.vmem [shape: bf16[128,576], index: 0, kind: input, shape index: {}]   ;;  %s1644_s1 = inlined_call_operand.vmem [shape: bf16[576,128], index: 1, kind: input, shape index: {}]   ;;  %s1645_s2 = inlined_call_operand.vmem [shape: f32[1,128], index: 2, kind: input, shape index: {}]   ;;  %s1646_s3 = inlined_call_operand.vmem [shape: bf16[128,128], index: 3, kind: output, shape index: {}]  }
   0x1   :  { %s1474_s14 = smov 0  }
   0x2 LB: > { %s32_s15 = sadd.s32 1, %s1444_s13  ;;  %p1118_p0 = scmp.ge.s32.totalorder %s1448_s14, 1  ;;  %s1448_s14 = sphi %s1474_s14, %s13_s14   ;;  %s1444_s13 = sphi %s1472_s13, %s1648_s13   ;;  %s1440_s12 = sphi %s1470_s12, %s1647_s12  }
   0x3   : > { %p34_p1 = scmp.ge.s32.totalorder %s32_s15, 2  ;;  %p191_p2 = scmp.lt.s32.totalorder %s1448_s14, 3 }
   0x5   : > { %s1650_s15 = smov (%p34_p1, %s32_s15), 0  ;;  %p192_p3 = pnand %p1118_p0, %p191_p2 }
   0x6   : > { %v1362_v0 = vld [vmem:[%s1644_s1 + $0x40] sm:$0xff] (!%p192_p3)   ;;  %v1366_v4 = vld [vmem:[%s1644_s1 + $0x48] sm:$0xff] (!%p192_p3)   ;;  %v1370_v8 = vld [vmem:[%s1644_s1 + $0x50] sm:$0xff] (!%p192_p3)   ;;  %s1119_s23 = sshll.u32 (!%p192_p3), %s1440_s12, 3  ;;  %vm700_vm0 = vcmask (!%p192_p3), 523264  }
   0x7   : > { %195 = sbr.rel (%p192_p3) target bundleno = 297 (0x129), region = 32  ;;  %v1363_v1 = vld [vmem:[%s1644_s1 + $0xc0] sm:$0xff] (!%p192_p3)   ;;  %1225 = vmatprep.subr.bf16.mxu0 (!%p192_p3), %v1362_v0  ;;  %v1367_v5 = vld [vmem:[%s1644_s1 + $0xc8] sm:$0xff] (!%p192_p3)   ;;  %v1371_v9 = vld [vmem:[%s1644_s1 + $0xd0] sm:$0xff] (!%p192_p3)   ;;  %p236_p4 = scmp.lt.s32.totalorder (!%p192_p3), %s1119_s23, 15 }
   0x8   : > { %v1364_v2 = vld [vmem:[%s1644_s1] sm:$0xff] (!%p192_p3)   ;;  %1265 = vmatprep.subr.bf16.mxu1 (!%p192_p3), %v1363_v1  ;;  %v1368_v6 = vld [vmem:[%s1644_s1 + $0x8] sm:$0xff] (!%p192_p3)   ;;  %v1372_v10 = vld [vmem:[%s1644_s1 + $0x10] sm:$0xff] (!%p192_p3)  }
   0x9   : > { %v1365_v3 = vld [vmem:[%s1644_s1 + $0x80] sm:$0xff] (!%p192_p3)   ;;  %1226 = vmatpush3.bf16.msra.mxu0 (!%p192_p3), %v1364_v2  ;;  %v1369_v7 = vld [vmem:[%s1644_s1 + $0x88] sm:$0xff] (!%p192_p3)   ;;  %v1373_v11 = vld [vmem:[%s1644_s1 + $0x90] sm:$0xff] (!%p192_p3)  }
   0xa   : > { %1266 = vmatpush3.bf16.msra.mxu1 (!%p192_p3), %v1365_v3  ;;  %1227 = vmatprep.subr.bf16.mxu0 (!%p192_p3), %v1366_v4  ;;  %v1374_v12 = vld [vmem:[%s1644_s1 + $0x58] sm:$0xff] (!%p192_p3)   ;;  %v1378_v16 = vld [vmem:[%s1644_s1 + $0x60] sm:$0xff] (!%p192_p3)   ;;  %v1382_v20 = vld [vmem:[%s1644_s1 + $0x68] sm:$0xff] (!%p192_p3)  }
   0xb   : > { %1267 = vmatprep.subr.bf16.mxu1 (!%p192_p3), %v1367_v5  ;;  %v1375_v13 = vld [vmem:[%s1644_s1 + $0xd8] sm:$0xff] (!%p192_p3)   ;;  %v1379_v17 = vld [vmem:[%s1644_s1 + $0xe0] sm:$0xff] (!%p192_p3)   ;;  %v1383_v21 = vld [vmem:[%s1644_s1 + $0xe8] sm:$0xff] (!%p192_p3)  }
   0xc   : > { %v1376_v14 = vld [vmem:[%s1644_s1 + $0x18] sm:$0xff] (!%p192_p3)   ;;  %v1380_v18 = vld [vmem:[%s1644_s1 + $0x20] sm:$0xff] (!%p192_p3)   ;;  %v1384_v22 = vld [vmem:[%s1644_s1 + $0x28] sm:$0xff] (!%p192_p3)  }
   0xd   : > { %1228 = vmatpush3.bf16.msra.mxu0 (!%p192_p3), %v1368_v6  ;;  %v1377_v15 = vld [vmem:[%s1644_s1 + $0x98] sm:$0xff] (!%p192_p3)   ;;  %v1381_v19 = vld [vmem:[%s1644_s1 + $0xa0] sm:$0xff] (!%p192_p3)   ;;  %v1385_v23 = vld [vmem:[%s1644_s1 + $0xa8] sm:$0xff] (!%p192_p3)  }
   0xe   : > { %1268 = vmatpush3.bf16.msra.mxu1 %v1369_v7  ;;  %1229 = vmatprep.subr.bf16.mxu0 %v1370_v8  ;;  %s1652_s23 = smov (!%p236_p4, %s1119_s23), 15  ;;  %v1386_v24 = vld [vmem:[%s1644_s1 + $0x70] sm:$0xff]   ;;  %v1390_v28 = vld [vmem:[%s1644_s1 + $0x78] sm:$0xff]   ;;  %v1400_v36 = vld [vmem:[%s1644_s1 + $0x100] sm:$0xff]  }
   0xf   : > { %1269 = vmatprep.subr.bf16.mxu1 %v1371_v9  ;;  %v1387_v25 = vld [vmem:[%s1644_s1 + $0xf0] sm:$0xff]   ;;  %s1337_s22 = smul.u32 20, %s1652_s23  ;;  %v1391_v29 = vld [vmem:[%s1644_s1 + $0xf8] sm:$0xff]   ;;  %v1407_v39 = vld [vmem:[%s1644_s1 + $0x108] sm:$0xff]   ;;  %s1122_s26 = sshll.u32 %s1652_s23, 2 }
  0x10   : > { %v1388_v26 = vld [vmem:[%s1644_s1 + $0x30] sm:$0xff]   ;;  %v1392_v30 = vld [vmem:[%s1644_s1 + $0x38] sm:$0xff]   ;;  %s265_s29 = scalar_lea.vmem %s1646_s3, %s1122_s26 }
  0x11   : > { %1230 = vmatpush3.bf16.msra.mxu0 %v1372_v10  ;;  %v1389_v27 = vld [vmem:[%s1644_s1 + $0xb0] sm:$0xff]   ;;  %s1587_s6 = scalar_lea.vmem %s1643_s0, %s1337_s22  ;;  %v1393_v31 = vld [vmem:[%s1644_s1 + $0xb8] sm:$0xff]  }
  0x12   : > { %1270 = vmatpush3.bf16.msra.mxu1 %v1373_v11  ;;  %1231 = vmatprep.subr.bf16.mxu0 %v1374_v12  ;;  %v1394_v32 = vld [vmem:[%s1587_s6] ss:$20 sps:$4 sm:$0xff]   ;;  %v1396_v33 = vld [vmem:[%s1587_s6 + $0x4] ss:$20 sps:$4 sm:$0xff]   ;;  %v1397_v34 = vld [vmem:[%s1587_s6 + $0x8] ss:$20 sps:$4 sm:$0xff]  }
  0x13   : > { %1271 = vmatprep.subr.bf16.mxu1 %v1375_v13  ;;  %v1399_v35 = vld [vmem:[%s1587_s6 + $0xc] ss:$20 sps:$4 sm:$0xff]   ;;  %745 = vmatprep.mubr.bf16.mxu0 %v1396_v33  ;;  %v1403_v38 = vld [vmem:[%s1587_s6 + $0x34] ss:$20 sps:$4 sm:$0xff]   ;;  %v1406_v41 = vld [vmem:[%s1587_s6 + $0x30] ss:$20 sps:$4 sm:$0xff]  }
  0x14   : > { %810 = vmatprep.mubr.bf16.mxu1 %v1399_v35  ;;  %v1401_v37 = vld [vmem:[%s1587_s6 + $0x2c] ss:$20 sps:$4 sm:$0xff]   ;;  %v1405_v40 = vld [vmem:[%s1587_s6 + $0x28] ss:$20 sps:$4 sm:$0xff]   ;;  %v1414_v44 = vld [vmem:[%s1644_s1 + $0x110] sm:$0xff]  }
  0x15   : > { %1232 = vmatpush3.bf16.msra.mxu0 %v1376_v14  ;;  %v1408_v42 = vld [vmem:[%s1587_s6 + $0x54] ss:$20 sps:$4 sm:$0xff]   ;;  %v1410_v43 = vld [vmem:[%s1587_s6 + $0x5c] ss:$20 sps:$4 sm:$0xff]   ;;  %v1413_v47 = vld [vmem:[%s1587_s6 + $0x58] ss:$20 sps:$4 sm:$0xff]  }
  0x16   : > { %1272 = vmatpush3.bf16.msra.mxu1 %v1377_v15  ;;  %1233 = vmatprep.subr.bf16.mxu0 %v1378_v16  ;;  %v1421_v45 = vld [vmem:[%s1644_s1 + $0x118] sm:$0xff]   ;;  %v1412_v46 = vld [vmem:[%s1587_s6 + $0x50] ss:$20 sps:$4 sm:$0xff]   ;;  %v1420_v51 = vld [vmem:[%s1587_s6 + $0x80] ss:$20 sps:$4 sm:$0xff]  }
  0x17   : > { %1273 = vmatprep.subr.bf16.mxu1 %v1379_v17  ;;  %v1415_v48 = vld [vmem:[%s1587_s6 + $0x7c] ss:$20 sps:$4 sm:$0xff]   ;;  %v1417_v49 = vld [vmem:[%s1587_s6 + $0x84] ss:$20 sps:$4 sm:$0xff]   ;;  %v1423_v53 = vld [vmem:[%s1587_s6 + $0x60] ss:$20 sps:$4 sm:$0xff]  }
  0x18   : > { %v1419_v50 = vld [vmem:[%s1587_s6 + $0x78] ss:$20 sps:$4 sm:$0xff]   ;;  %v1422_v52 = vld [vmem:[%s1587_s6 + $0x10] ss:$20 sps:$4 sm:$0xff]   ;;  %v1425_v55 = vld [vmem:[%s1587_s6 + $0x88] ss:$20 sps:$4 sm:$0xff]  }
  0x19   : > { %1234 = vmatpush3.bf16.msra.mxu0 %v1380_v18  ;;  %v1424_v54 = vld [vmem:[%s1587_s6 + $0x38] ss:$20 sps:$4 sm:$0xff]  }
  0x1a   : > { %1274 = vmatpush3.bf16.msra.mxu1 %v1381_v19  ;;  %1235 = vmatprep.subr.bf16.mxu0 %v1382_v20 }
  0x1b   : > { %1275 = vmatprep.subr.bf16.mxu1 %v1383_v21 }
  0x1d   : > { %1236 = vmatpush3.bf16.msra.mxu0 %v1384_v22 }
  0x1e   : > { %1276 = vmatpush3.bf16.msra.mxu1 %v1385_v23  ;;  %1237 = vmatprep.subr.bf16.mxu0 %v1386_v24 }
  0x1f   : > { %1277 = vmatprep.subr.bf16.mxu1 %v1387_v25 }
  0x21   : > { %1238 = vmatpush3.bf16.msra.mxu0 %v1388_v26 }
  0x22   : > { %1278 = vmatpush3.bf16.msra.mxu1 %v1389_v27  ;;  %1239 = vmatprep.subr.bf16.mxu0 %v1390_v28 }
  0x23   : > { %1279 = vmatprep.subr.bf16.mxu1 %v1391_v29 }
  0x25   : > { %1240 = vmatpush3.bf16.msra.mxu0 %v1392_v30 }
  0x26   : > { %1280 = vmatpush3.bf16.msra.mxu1 %v1393_v31  ;;  %1313 = vmatprep.subr.bf16.mxu0 %v1400_v36 }
  0x27   : > { %1329 = vmatprep.subr.bf16.mxu1 %v1400_v36 }
  0x28   : > { %746 = vmatmul.mubr.bf16.vlgmr.msra.gmra.mrb[0].mxu0 %v1394_v32 }
  0x29   : > { %811 = vmatmul.mubr.bf16.vlgmr.msra.gmra.mrb[0].mxu1 %v1397_v34  ;;  %1314 = vmatpush3.bf16.msra.mxu0 %v1400_v36 }
  0x2a   : > { %1333 = vmatpush3.bf16.msra.mxu1 %v1400_v36  ;;  %753 = vmatprep.mubr.bf16.mxu0 %v1401_v37 }
  0x2b   : > { %818 = vmatprep.mubr.bf16.mxu1 %v1403_v38  ;;  %1315 = vmatprep.subr.bf16.mxu0 %v1407_v39 }
  0x2c   : > { %1330 = vmatprep.subr.bf16.mxu1 %v1407_v39 }
  0x2d   : > { %1316 = vmatpush3.bf16.msra.mxu0 %v1407_v39 }
  0x2e   : > { %1334 = vmatpush3.bf16.msra.mxu1 %v1407_v39  ;;  %1317 = vmatprep.subr.bf16.mxu0 %v1414_v44 }
  0x2f   : > { %1331 = vmatprep.subr.bf16.mxu1 %v1414_v44 }
  0x30   : > { %754 = vmatmul.mubr.bf16.gmra.mrb[4].mxu0 %v1405_v40 }
  0x31   : > { %819 = vmatmul.mubr.bf16.gmra.mrb[4].mxu1 %v1406_v41  ;;  %761 = vmatprep.mubr.bf16.mxu0 %v1408_v42 }
  0x32   : > { %826 = vmatprep.mubr.bf16.mxu1 %v1410_v43  ;;  %1318 = vmatpush3.bf16.msra.mxu0 %v1414_v44 }
  0x33   : > { %1335 = vmatpush3.bf16.msra.mxu1 %v1414_v44  ;;  %1319 = vmatprep.subr.bf16.mxu0 %v1421_v45 }
  0x34   : > { %1332 = vmatprep.subr.bf16.mxu1 %v1421_v45 }
  0x36   : > { %1320 = vmatpush3.bf16.msra.mxu0 %v1421_v45 }
  0x37   : > { %1336 = vmatpush3.bf16.msra.mxu1 %v1421_v45 }
  0x38   : > { %762 = vmatmul.mubr.bf16.gmra.mrb[8].mxu0 %v1412_v46 }
  0x39   : > { %827 = vmatmul.mubr.bf16.gmra.mrb[8].mxu1 %v1413_v47  ;;  %769 = vmatprep.mubr.bf16.mxu0 %v1415_v48 }
  0x3a   : > { %834 = vmatprep.mubr.bf16.mxu1 %v1417_v49  ;;  %v1183_v49 = vld [vmem:[%s1645_s2] ss:$0 sm:$0xff] }
  0x40   : > { %770 = vmatmul.mubr.bf16.gmra.mrb[12].mxu0 %v1419_v50 }
  0x41   : > { %835 = vmatmul.mubr.bf16.gmra.mrb[12].mxu1 %v1420_v51  ;;  %1321 = vmatprep.mubr.msk.bf16.mxu0 %vm700_vm0, %v1422_v52 }
  0x42   : > { %1325 = vmatprep.mubr.msk.bf16.mxu1 %vm700_vm0, %v1423_v53 }
  0x48   : > { %1322 = vmatmul.mubr.msk.bf16.vlgmr.msra.gmra.mrb[16].mxu0 %vm700_vm0, %v1424_v54 }
  0x49   : > { %1326 = vmatmul.mubr.msk.bf16.vlgmr.msra.gmra.mrb[16].mxu1 %vm700_vm0, %v1425_v55 }
  0xfb   : > { %v1241_v56 = vpop.f32.mrb[0].mxu0 }
  0xfc   : > { %v1281_v57 = vpop.f32.mrb[0].mxu1  ;;  %v1242_v58 = vpop.f32.mrb[1].mxu0 }
  0xfd   : > { %v1243_v59 = vadd.f32 %v1242_v58, %v1241_v56  ;;  %v1282_v60 = vpop.f32.mrb[1].mxu1  ;;  %v1244_v61 = vpop.f32.mrb[2].mxu0 }
  0xfe   : > { %v1283_v62 = vadd.f32 %v1282_v60, %v1281_v57  ;;  %v1284_v63 = vpop.f32.mrb[2].mxu1  ;;  %v1245_v0 = vpop.f32.mrb[3].mxu0 }
  0xff   : > { %v1246_v1 = vadd.f32 %v1245_v0, %v1244_v61  ;;  %v1285_v2 = vpop.f32.mrb[3].mxu1 }
 0x100   : > { %v1286_v3 = vadd.f32 %v1285_v2, %v1284_v63  ;;  %v813_v4 = vadd.f32 %v1283_v62, %v1243_v59 }
 0x102   : > { %v816_v5 = vadd.f32 %v1286_v3, %v1246_v1 }
 0x103   : > { %v1247_v6 = vpop.f32.mrb[4].mxu0 }
 0x104   : > { %v1287_v7 = vpop.f32.mrb[4].mxu1  ;;  %v1248_v8 = vpop.f32.mrb[5].mxu0 }
 0x105   : > { %v1249_v9 = vadd.f32 %v1248_v8, %v1247_v6  ;;  %v1288_v10 = vpop.f32.mrb[5].mxu1  ;;  %v1250_v11 = vpop.f32.mrb[6].mxu0 }
 0x106   : > { %v1289_v12 = vadd.f32 %v1288_v10, %v1287_v7  ;;  %v1290_v13 = vpop.f32.mrb[6].mxu1  ;;  %v1251_v14 = vpop.f32.mrb[7].mxu0 }
 0x107   : > { %v1252_v15 = vadd.f32 %v1251_v14, %v1250_v11  ;;  %v1291_v16 = vpop.f32.mrb[7].mxu1 }
 0x108   : > { %v1292_v17 = vadd.f32 %v1291_v16, %v1290_v13  ;;  %v821_v18 = vadd.f32 %v1289_v12, %v1249_v9 }
 0x10a   : > { %v824_v19 = vadd.f32 %v1292_v17, %v1252_v15 }
 0x10b   : > { %v1253_v20 = vpop.f32.mrb[8].mxu0 }
 0x10c   : > { %v1293_v21 = vpop.f32.mrb[8].mxu1  ;;  %v1254_v22 = vpop.f32.mrb[9].mxu0 }
 0x10d   : > { %v1255_v23 = vadd.f32 %v1254_v22, %v1253_v20  ;;  %v1294_v24 = vpop.f32.mrb[9].mxu1  ;;  %v1256_v25 = vpop.f32.mrb[10].mxu0 }
 0x10e   : > { %v1295_v26 = vadd.f32 %v1294_v24, %v1293_v21  ;;  %v1296_v27 = vpop.f32.mrb[10].mxu1  ;;  %v1257_v28 = vpop.f32.mrb[11].mxu0 }
 0x10f   : > { %v1258_v29 = vadd.f32 %v1257_v28, %v1256_v25  ;;  %v1297_v30 = vpop.f32.mrb[11].mxu1 }
 0x110   : > { %v1298_v31 = vadd.f32 %v1297_v30, %v1296_v27  ;;  %v829_v32 = vadd.f32 %v1295_v26, %v1255_v23 }
 0x112   : > { %v832_v33 = vadd.f32 %v1298_v31, %v1258_v29 }
 0x113   : > { %v1259_v34 = vpop.f32.mrb[12].mxu0 }
 0x114   : > { %v1299_v35 = vpop.f32.mrb[12].mxu1  ;;  %v1260_v36 = vpop.f32.mrb[13].mxu0 }
 0x115   : > { %v1261_v37 = vadd.f32 %v1260_v36, %v1259_v34  ;;  %v1300_v38 = vpop.f32.mrb[13].mxu1  ;;  %v1262_v39 = vpop.f32.mrb[14].mxu0 }
 0x116   : > { %v1301_v40 = vadd.f32 %v1300_v38, %v1299_v35  ;;  %v1302_v41 = vpop.f32.mrb[14].mxu1  ;;  %v1263_v42 = vpop.f32.mrb[15].mxu0 }
 0x117   : > { %v1264_v43 = vadd.f32 %v1263_v42, %v1262_v39  ;;  %v1303_v44 = vpop.f32.mrb[15].mxu1 }
 0x118   : > { %v1304_v45 = vadd.f32 %v1303_v44, %v1302_v41  ;;  %v837_v46 = vadd.f32 %v1301_v40, %v1261_v37 }
 0x11a   : > { %v840_v47 = vadd.f32 %v1304_v45, %v1264_v43 }
 0x11b   : > { %v1323_v48 = vpop.f32.mrb[16].mxu0 }
 0x11c   : > { %v886_v50 = vadd.f32 %v1323_v48, %v821_v18  ;;  %v1327_v51 = vpop.f32.mrb[16].mxu1  ;;  %v877_v52 = vpop.f32.mrb[17].mxu0 }
 0x11d   : > { %v902_v53 = vadd.f32 %v1327_v51, %v837_v46  ;;  %v878_v54 = vadd.f32 %v877_v52, %v813_v4  ;;  %v893_v55 = vpop.f32.mrb[17].mxu1  ;;  %v1324_v56 = vpop.f32.mrb[18].mxu0 }
 0x11e   : > { %v944_v57 = vadd.f32 %v1183_v49, %v886_v50  ;;  %v894_v58 = vadd.f32 %v893_v55, %v829_v32  ;;  %v889_v59 = vadd.f32 %v1324_v56, %v824_v19  ;;  %v1328_v60 = vpop.f32.mrb[18].mxu1  ;;  %v880_v61 = vpop.f32.mrb[19].mxu0 }
 0x11f   : > { %v948_v62 = vadd.f32 %v1183_v49, %v902_v53  ;;  %v942_v63 = vadd.f32 %v1183_v49, %v878_v54  ;;  %v905_v0 = vadd.f32 %v1328_v60, %v840_v47  ;;  %v881_v1 = vadd.f32 %v880_v61, %v816_v5  ;;  %v896_v2 = vpop.f32.mrb[19].mxu1 }
 0x120   : > { %v946_v3 = vadd.f32 %v1183_v49, %v894_v58  ;;  %v945_v6 = vadd.f32 %v1183_v49, %v889_v59  ;;  %v897_v7 = vadd.f32 %v896_v2, %v832_v33  ;;  %v952_v10 = vmax.f32 %v944_v57, 0.0 }
 0x121   : > { %v949_v8 = vadd.f32 %v1183_v49, %v905_v0  ;;  %v943_v9 = vadd.f32 %v1183_v49, %v881_v1  ;;  %v956_v12 = vmax.f32 %v948_v62, 0.0  ;;  %v950_v13 = vmax.f32 %v942_v63, 0.0 }
 0x122   : > { %v953_v4 = vmax.f32 %v945_v6, 0.0  ;;  %v947_v11 = vadd.f32 %v1183_v49, %v897_v7  ;;  %v954_v16 = vmax.f32 %v946_v3, 0.0 }
 0x123   : > { %v957_v14 = vmax.f32 %v949_v8, 0.0  ;;  %v951_v15 = vmax.f32 %v943_v9, 0.0 }
 0x124   : > { %v1210_v5 = vpack.c.bf16 %v953_v4, %v952_v10  ;;  %v955_v17 = vmax.f32 %v947_v11, 0.0 }
 0x125   : > { %v1220_v18 = vpack.c.bf16 %v957_v14, %v956_v12  ;;  %v1205_v19 = vpack.c.bf16 %v951_v15, %v950_v13 }
 0x126   : > { %1222 = vst [vmem:[%s265_s29 + $0x8] sm:$0xff] %v1210_v5   ;;  %v1215_v20 = vpack.c.bf16 %v955_v17, %v954_v16 }
 0x127   : > { %1224 = vst [vmem:[%s265_s29 + $0x18] sm:$0xff] %v1220_v18   ;;  %1206 = vst [vmem:[%s265_s29] sm:$0xff] %v1205_v19  }
 0x128   : > { %1223 = vst [vmem:[%s265_s29 + $0x10] sm:$0xff] %v1215_v20  }
 0x129 PF: > { %s13_s14 = sadd.s32 1, %s1448_s14   ;;  %s1647_s12 = smov %s1444_s13 }
 0x12a   : > { %p10_p5 = scmp.ge.s32.totalorder %s13_s14, 4   ;;  %s1648_s13 = smov %s1650_s15 }
 0x12c   :  { %12 = sbr.rel (!%p10_p5) target bundleno = 2 (0x2), region = 76 }

// kernel: basic_block2_forward.5
= control target key start
LH: loop header
LB: loop body
LE: loop exit
PB: predicated region body
PF: predicated region fallthrough
CT: control target
= control target key end

     0   :  { %9 = vsyncpa [#allocation4], 0  ;;  %s2727_s0 = inlined_call_operand.vmem [shape: bf16[128,1152], index: 0, kind: input, shape index: {}]   ;;  %s2728_s1 = inlined_call_operand.vmem [shape: bf16[1152,128], index: 1, kind: input, shape index: {}]   ;;  %s2729_s2 = inlined_call_operand.vmem [shape: f32[1,128], index: 2, kind: input, shape index: {}]   ;;  %s2730_s3 = inlined_call_operand.vmem [shape: bf16[128,128], index: 3, kind: input, shape index: {}]   ;;  %s2731_s4 = inlined_call_operand.hbm [shape: f32[128,128], index: 4, kind: output, shape index: {}]  }
   0x1   :  { %11 = vsyncpa [#allocation4 + $0x1], 0  ;;  %s2336_s15 = smov 0   ;;  %s2338_s16 = smov 0  }
   0x2   :  { %s2340_s17 = smov 0   ;;  %s2342_s18 = smov 0  }
   0x3   :  { %s2344_s19 = smov 0   ;;  %s2346_s20 = smov 0  }
   0x4 LB: > { %s1688_s21 = sadd.s32 4294967295, %s2306_s20   ;;  %s1689_s22 = sadd.s32 4294967294, %s2306_s20   ;;  %s2306_s20 = sphi %s2346_s20, %s17_s20   ;;  %s2302_s19 = sphi %s2344_s19, %s2738_s19   ;;  %s2298_s18 = sphi %s2342_s18, %s2737_s18   ;;  %s2294_s17 = sphi %s2340_s17, %s2736_s17   ;;  %s2290_s16 = sphi %s2338_s16, %s2735_s16   ;;  %s2286_s15 = sphi %s2336_s15, %s2734_s15  }
   0x5   : > { %s36_s23 = sadd.s32 1, %s2302_s19  ;;  %s155_s24 = sadd.s32 1, %s2294_s17 }
   0x6   : > { %p38_p0 = scmp.ge.s32.totalorder %s36_s23, 2  ;;  %p165_p1 = scmp.ne.s32.totalorder %s2294_s17, %s2290_s16 }
   0x7   : > { %p166_p2 = scmp.eq.s32.totalorder %s1688_s21, 1  ;;  %p171_p3 = scmp.ne.s32.totalorder %s2290_s16, %s2286_s15 }
   0x8   : > { %s2740_s23 = smov (%p38_p0, %s36_s23), 0  ;;  %p172_p5 = scmp.eq.s32.totalorder %s1689_s22, 1 }
   0x9   : > { %p2376_p4 = por %p166_p2, %p165_p1  ;;  %s150_s26 = ssub.s32 %s2302_s19, %s2740_s23 }
   0xa   : > { %p1694_p6 = scmp.ge.s32.totalorder %s2306_s20, 1  ;;  %p153_p7 = scmp.eq.s32.totalorder %s150_s26, 0 }
   0xb   : > { %p2383_p8 = por %p172_p5, %p171_p3  ;;  %p235_p9 = scmp.lt.s32.totalorder %s2306_s20, 3 }
   0xc   : > { %s2389_s28 = scalar_select %p153_p7, %s2294_s17, %s155_s24  }
   0xd   : > { %p236_p10 = pnand %p1694_p6, %p235_p9 }
   0xe   : > { %v2104_v0 = vld [vmem:[%s2728_s1 + $0x40] sm:$0xff] (!%p236_p10)   ;;  %v2108_v4 = vld [vmem:[%s2728_s1 + $0x48] sm:$0xff] (!%p236_p10)   ;;  %v2112_v8 = vld [vmem:[%s2728_s1 + $0x50] sm:$0xff] (!%p236_p10)   ;;  %s1696_s24 = sshll.u32 (!%p236_p10), %s2298_s18, 3  ;;  %s1814_s12 = sshll.u32 (!%p236_p10), %s2298_s18, 10 }
   0xf   : > { %239 = sbr.rel (%p236_p10) target bundleno = 352 (0x160), region = 36  ;;  %v2105_v1 = vld [vmem:[%s2728_s1 + $0xc0] sm:$0xff] (!%p236_p10)   ;;  %1834 = vmatprep.subr.bf16.mxu0 (!%p236_p10), %v2104_v0  ;;  %v2109_v5 = vld [vmem:[%s2728_s1 + $0xc8] sm:$0xff] (!%p236_p10)   ;;  %v2113_v9 = vld [vmem:[%s2728_s1 + $0xd0] sm:$0xff] (!%p236_p10)   ;;  %p287_p11 = scmp.lt.s32.totalorder (!%p236_p10), %s1696_s24, 15 }
  0x10   : > { %v2106_v2 = vld [vmem:[%s2728_s1] sm:$0xff] (!%p236_p10)   ;;  %1874 = vmatprep.subr.bf16.mxu1 (!%p236_p10), %v2105_v1  ;;  %v2110_v6 = vld [vmem:[%s2728_s1 + $0x8] sm:$0xff] (!%p236_p10)   ;;  %v2114_v10 = vld [vmem:[%s2728_s1 + $0x10] sm:$0xff] (!%p236_p10)   ;;  %s2675_s18 = scalar_lea.hbm (!%p236_p10), %s2731_s4, %s1814_s12  ;;  %s2308_s30 = smov (!%p236_p10), [#allocation3]  }
  0x11   : > { %v2107_v3 = vld [vmem:[%s2728_s1 + $0x80] sm:$0xff] (!%p236_p10)   ;;  %1835 = vmatpush3.bf16.msra.mxu0 (!%p236_p10), %v2106_v2  ;;  %v2111_v7 = vld [vmem:[%s2728_s1 + $0x88] sm:$0xff] (!%p236_p10)   ;;  %v2115_v11 = vld [vmem:[%s2728_s1 + $0x90] sm:$0xff] (!%p236_p10)  }
  0x12   : > { %1875 = vmatpush3.bf16.msra.mxu1 (!%p236_p10), %v2107_v3  ;;  %1836 = vmatprep.subr.bf16.mxu0 (!%p236_p10), %v2108_v4  ;;  %v2116_v12 = vld [vmem:[%s2728_s1 + $0x58] sm:$0xff] (!%p236_p10)   ;;  %v2120_v16 = vld [vmem:[%s2728_s1 + $0x60] sm:$0xff] (!%p236_p10)   ;;  %v2124_v20 = vld [vmem:[%s2728_s1 + $0x68] sm:$0xff] (!%p236_p10)  }
  0x13   : > { %1876 = vmatprep.subr.bf16.mxu1 (!%p236_p10), %v2109_v5  ;;  %v2117_v13 = vld [vmem:[%s2728_s1 + $0xd8] sm:$0xff] (!%p236_p10)   ;;  %v2121_v17 = vld [vmem:[%s2728_s1 + $0xe0] sm:$0xff] (!%p236_p10)   ;;  %v2125_v21 = vld [vmem:[%s2728_s1 + $0xe8] sm:$0xff] (!%p236_p10)  }
  0x14   : > { %v2118_v14 = vld [vmem:[%s2728_s1 + $0x18] sm:$0xff] (!%p236_p10)   ;;  %v2122_v18 = vld [vmem:[%s2728_s1 + $0x20] sm:$0xff] (!%p236_p10)   ;;  %v2126_v22 = vld [vmem:[%s2728_s1 + $0x28] sm:$0xff] (!%p236_p10)  }
  0x15   : > { %1837 = vmatpush3.bf16.msra.mxu0 (!%p236_p10), %v2110_v6  ;;  %v2119_v15 = vld [vmem:[%s2728_s1 + $0x98] sm:$0xff] (!%p236_p10)   ;;  %v2123_v19 = vld [vmem:[%s2728_s1 + $0xa0] sm:$0xff] (!%p236_p10)   ;;  %v2127_v23 = vld [vmem:[%s2728_s1 + $0xa8] sm:$0xff] (!%p236_p10)  }
  0x16   : > { %1877 = vmatpush3.bf16.msra.mxu1 %v2111_v7  ;;  %1838 = vmatprep.subr.bf16.mxu0 %v2112_v8  ;;  %s2742_s24 = smov (!%p287_p11, %s1696_s24), 15  ;;  %v2128_v24 = vld [vmem:[%s2728_s1 + $0x70] sm:$0xff]   ;;  %v2132_v28 = vld [vmem:[%s2728_s1 + $0x78] sm:$0xff]   ;;  %v2142_v36 = vld [vmem:[%s2728_s1 + $0x140] sm:$0xff]  }
  0x17   : > { %1878 = vmatprep.subr.bf16.mxu1 %v2113_v9  ;;  %v2129_v25 = vld [vmem:[%s2728_s1 + $0xf0] sm:$0xff]   ;;  %s2046_s9 = smul.u32 36, %s2742_s24  ;;  %v2133_v29 = vld [vmem:[%s2728_s1 + $0xf8] sm:$0xff]   ;;  %v2143_v37 = vld [vmem:[%s2728_s1 + $0x1c0] sm:$0xff]  }
  0x18   : > { %v2130_v26 = vld [vmem:[%s2728_s1 + $0x30] sm:$0xff]   ;;  %v2134_v30 = vld [vmem:[%s2728_s1 + $0x38] sm:$0xff]   ;;  %v2144_v38 = vld [vmem:[%s2728_s1 + $0x100] sm:$0xff]  }
  0x19   : > { %1839 = vmatpush3.bf16.msra.mxu0 %v2114_v10  ;;  %v2131_v27 = vld [vmem:[%s2728_s1 + $0xb0] sm:$0xff]   ;;  %s2488_s5 = scalar_lea.vmem %s2727_s0, %s2046_s9  ;;  %v2135_v31 = vld [vmem:[%s2728_s1 + $0xb8] sm:$0xff]   ;;  %v2145_v39 = vld [vmem:[%s2728_s1 + $0x180] sm:$0xff]  }
  0x1a   : > { %1879 = vmatpush3.bf16.msra.mxu1 %v2115_v11  ;;  %1840 = vmatprep.subr.bf16.mxu0 %v2116_v12  ;;  %v2136_v32 = vld [vmem:[%s2488_s5] ss:$36 sps:$4 sm:$0xff]   ;;  %v2139_v34 = vld [vmem:[%s2488_s5 + $0x8] ss:$36 sps:$4 sm:$0xff]   ;;  %v2152_v45 = vld [vmem:[%s2488_s5 + $0x54] ss:$36 sps:$4 sm:$0xff]  }
  0x1b   : > { %1880 = vmatprep.subr.bf16.mxu1 %v2117_v13  ;;  %v2138_v33 = vld [vmem:[%s2488_s5 + $0x4] ss:$36 sps:$4 sm:$0xff]   ;;  %v2141_v35 = vld [vmem:[%s2488_s5 + $0xc] ss:$36 sps:$4 sm:$0xff]   ;;  %v2160_v52 = vld [vmem:[%s2728_s1 + $0x158] sm:$0xff]  }
  0x1c   : > { %1172 = vmatprep.mubr.bf16.mxu0 %v2138_v33  ;;  %1237 = vmatprep.mubr.bf16.mxu1 %v2141_v35  ;;  %v2146_v40 = vld [vmem:[%s2728_s1 + $0x148] sm:$0xff]   ;;  %v2155_v47 = vld [vmem:[%s2488_s5 + $0x50] ss:$36 sps:$4 sm:$0xff]   ;;  %v2161_v53 = vld [vmem:[%s2728_s1 + $0x1d8] sm:$0xff]  }
  0x1d   : > { %1841 = vmatpush3.bf16.msra.mxu0 %v2118_v14  ;;  %v2147_v41 = vld [vmem:[%s2728_s1 + $0x1c8] sm:$0xff]   ;;  %v2156_v48 = vld [vmem:[%s2728_s1 + $0x150] sm:$0xff]   ;;  %v2162_v54 = vld [vmem:[%s2728_s1 + $0x118] sm:$0xff]  }
  0x1e   : > { %1881 = vmatpush3.bf16.msra.mxu1 %v2119_v15  ;;  %1842 = vmatprep.subr.bf16.mxu0 %v2120_v16  ;;  %v2148_v42 = vld [vmem:[%s2728_s1 + $0x108] sm:$0xff]   ;;  %v2157_v49 = vld [vmem:[%s2728_s1 + $0x1d0] sm:$0xff]   ;;  %v2163_v55 = vld [vmem:[%s2728_s1 + $0x198] sm:$0xff]  }
  0x1f   : > { %1882 = vmatprep.subr.bf16.mxu1 %v2121_v17  ;;  %v2149_v43 = vld [vmem:[%s2728_s1 + $0x188] sm:$0xff]   ;;  %v2158_v50 = vld [vmem:[%s2728_s1 + $0x110] sm:$0xff]   ;;  %v2166_v57 = vld [vmem:[%s2488_s5 + $0x9c] ss:$36 sps:$4 sm:$0xff]  }
  0x20   : > { %v2150_v44 = vld [vmem:[%s2488_s5 + $0x4c] ss:$36 sps:$4 sm:$0xff]   ;;  %v2164_v56 = vld [vmem:[%s2488_s5 + $0x94] ss:$36 sps:$4 sm:$0xff]   ;;  %v2170_v60 = vld [vmem:[%s2728_s1 + $0x160] sm:$0xff]  }
  0x21   : > { %1843 = vmatpush3.bf16.msra.mxu0 %v2122_v18  ;;  %v2154_v46 = vld [vmem:[%s2488_s5 + $0x48] ss:$36 sps:$4 sm:$0xff]   ;;  %v2159_v51 = vld [vmem:[%s2728_s1 + $0x190] sm:$0xff]   ;;  %v2169_v59 = vld [vmem:[%s2488_s5 + $0x98] ss:$36 sps:$4 sm:$0xff]  }
  0x22   : > { %1883 = vmatpush3.bf16.msra.mxu1 %v2123_v19  ;;  %1844 = vmatprep.subr.bf16.mxu0 %v2124_v20  ;;  %v2168_v58 = vld [vmem:[%s2488_s5 + $0x90] ss:$36 sps:$4 sm:$0xff]   ;;  %v2171_v61 = vld [vmem:[%s2728_s1 + $0x1e0] sm:$0xff]   ;;  %v2174_v0 = vld [vmem:[%s2728_s1 + $0x168] sm:$0xff]  }
  0x23   : > { %1884 = vmatprep.subr.bf16.mxu1 %v2125_v21  ;;  %v2172_v62 = vld [vmem:[%s2728_s1 + $0x120] sm:$0xff]   ;;  %v2175_v1 = vld [vmem:[%s2728_s1 + $0x1e8] sm:$0xff]   ;;  %v2182_v6 = vld [vmem:[%s2488_s5 + $0xd8] ss:$36 sps:$4 sm:$0xff]  }
  0x24   : > { %v2173_v63 = vld [vmem:[%s2728_s1 + $0x1a0] sm:$0xff]   ;;  %v2176_v2 = vld [vmem:[%s2728_s1 + $0x128] sm:$0xff]   ;;  %v2184_v8 = vld [vmem:[%s2728_s1 + $0x170] sm:$0xff]  }
  0x25   : > { %1845 = vmatpush3.bf16.msra.mxu0 %v2126_v22  ;;  %v2177_v3 = vld [vmem:[%s2728_s1 + $0x1a8] sm:$0xff]   ;;  %v2178_v4 = vld [vmem:[%s2488_s5 + $0xdc] ss:$36 sps:$4 sm:$0xff]   ;;  %v2185_v9 = vld [vmem:[%s2728_s1 + $0x1f0] sm:$0xff]  }
  0x26   : > { %1885 = vmatpush3.bf16.msra.mxu1 %v2127_v23  ;;  %1846 = vmatprep.subr.bf16.mxu0 %v2128_v24  ;;  %v2180_v5 = vld [vmem:[%s2488_s5 + $0xe4] ss:$36 sps:$4 sm:$0xff]   ;;  %v2186_v10 = vld [vmem:[%s2728_s1 + $0x130] sm:$0xff]   ;;  %v2188_v12 = vld [vmem:[%s2728_s1 + $0x178] sm:$0xff]  }
  0x27   : > { %1886 = vmatprep.subr.bf16.mxu1 %v2129_v25  ;;  %v2183_v7 = vld [vmem:[%s2488_s5 + $0xe0] ss:$36 sps:$4 sm:$0xff]   ;;  %v2187_v11 = vld [vmem:[%s2728_s1 + $0x1b0] sm:$0xff]   ;;  %v2189_v13 = vld [vmem:[%s2728_s1 + $0x1f8] sm:$0xff]  }
  0x28   : > { %v2190_v14 = vld [vmem:[%s2728_s1 + $0x138] sm:$0xff]   ;;  %v2192_v16 = vld [vmem:[%s2488_s5 + $0x10] ss:$36 sps:$4 sm:$0xff]   ;;  %v2198_v20 = vld [vmem:[%s2728_s1 + $0x200] sm:$0xff]  }
  0x29   : > { %1847 = vmatpush3.bf16.msra.mxu0 %v2130_v26  ;;  %v2191_v15 = vld [vmem:[%s2728_s1 + $0x1b8] sm:$0xff]   ;;  %v2199_v21 = vld [vmem:[%s2728_s1 + $0x208] sm:$0xff]   ;;  %v2205_v25 = vld [vmem:[%s2488_s5 + $0x60] ss:$36 sps:$4 sm:$0xff]  }
  0x2a   : > { %1887 = vmatpush3.bf16.msra.mxu1 %v2131_v27  ;;  %1848 = vmatprep.subr.bf16.mxu0 %v2132_v28  ;;  %v2194_v17 = vld [vmem:[%s2488_s5 + $0x14] ss:$36 sps:$4 sm:$0xff]   ;;  %v2197_v19 = vld [vmem:[%s2488_s5 + $0x1c] ss:$36 sps:$4 sm:$0xff]   ;;  %v2202_v23 = vld [vmem:[%s2488_s5 + $0x64] ss:$36 sps:$4 sm:$0xff]  }
  0x2b   : > { %1888 = vmatprep.subr.bf16.mxu1 %v2133_v29  ;;  %v2195_v18 = vld [vmem:[%s2488_s5 + $0x18] ss:$36 sps:$4 sm:$0xff]   ;;  %v2206_v26 = vld [vmem:[%s2728_s1 + $0x210] sm:$0xff]   ;;  %v2208_v27 = vld [vmem:[%s2488_s5 + $0xa4] ss:$36 sps:$4 sm:$0xff]  }
  0x2c   : > { %v2200_v22 = vld [vmem:[%s2488_s5 + $0x5c] ss:$36 sps:$4 sm:$0xff]   ;;  %v2210_v28 = vld [vmem:[%s2488_s5 + $0xac] ss:$36 sps:$4 sm:$0xff]  }
  0x2d   : > { %1849 = vmatpush3.bf16.msra.mxu0 %v2134_v30  ;;  %v2204_v24 = vld [vmem:[%s2488_s5 + $0x58] ss:$36 sps:$4 sm:$0xff]   ;;  %v2212_v30 = vld [vmem:[%s2488_s5 + $0xa0] ss:$36 sps:$4 sm:$0xff]   ;;  %v2216_v33 = vld [vmem:[%s2488_s5 + $0xec] ss:$36 sps:$4 sm:$0xff]  }
  0x2e   : > { %1889 = vmatpush3.bf16.msra.mxu1 %v2135_v31  ;;  %1914 = vmatprep.subr.bf16.mxu0 %v2142_v36  ;;  %v2207_v29 = vld [vmem:[%s2728_s1 + $0x218] sm:$0xff]   ;;  %v2213_v31 = vld [vmem:[%s2488_s5 + $0xa8] ss:$36 sps:$4 sm:$0xff]  }
  0x2f   : > { %1954 = vmatprep.subr.bf16.mxu1 %v2143_v37  ;;  %v2215_v35 = vld [vmem:[%s2728_s1 + $0x228] sm:$0xff]   ;;  %v2222_v37 = vld [vmem:[%s2728_s1 + $0x230] sm:$0xff]  }
  0x30   : > { %1173 = vmatmul.mubr.bf16.vlgmr.msra.gmra.mrb[0].mxu0 %v2136_v32  ;;  %v2214_v32 = vld [vmem:[%s2728_s1 + $0x220] sm:$0xff]   ;;  %v2220_v36 = vld [vmem:[%s2488_s5 + $0xe8] ss:$36 sps:$4 sm:$0xff]  }
  0x31   : > { %1238 = vmatmul.mubr.bf16.vlgmr.msra.gmra.mrb[0].mxu1 %v2139_v34  ;;  %1915 = vmatpush3.bf16.msra.mxu0 %v2144_v38  ;;  %v2218_v34 = vld [vmem:[%s2488_s5 + $0xf4] ss:$36 sps:$4 sm:$0xff]  }
  0x32   : > { %1955 = vmatpush3.bf16.msra.mxu1 %v2145_v39  ;;  %1916 = vmatprep.subr.bf16.mxu0 %v2146_v40  ;;  %v2221_v38 = vld [vmem:[%s2488_s5 + $0xf0] ss:$36 sps:$4 sm:$0xff]   ;;  %v2224_v39 = vld [vmem:[%s2488_s5 + $0x20] ss:$36 sps:$4 sm:$0xff]  }
  0x33   : > { %1956 = vmatprep.subr.bf16.mxu1 %v2147_v41  ;;  %1180 = vmatprep.mubr.bf16.mxu0 %v2150_v44  ;;  %v2225_v40 = vld [vmem:[%s2488_s5 + $0xb0] ss:$36 sps:$4 sm:$0xff]   ;;  %v2223_v41 = vld [vmem:[%s2728_s1 + $0x238] sm:$0xff]  }
  0x34   : > { %1245 = vmatprep.mubr.bf16.mxu1 %v2152_v45 }
  0x35   : > { %1917 = vmatpush3.bf16.msra.mxu0 %v2148_v42  ;;  %v2226_v42 = vld [vmem:[%s2488_s5 + $0x68] ss:$36 sps:$4 sm:$0xff]  }
  0x36   : > { %1957 = vmatpush3.bf16.msra.mxu1 %v2149_v43  ;;  %1918 = vmatprep.subr.bf16.mxu0 %v2156_v48  ;;  %v2227_v43 = vld [vmem:[%s2488_s5 + $0xf8] ss:$36 sps:$4 sm:$0xff]   ;;  %s1699_s5 = sshll.u32 %s2742_s24, 2  ;;  %s282_s24 = sand.u32 1, %s2290_s16  }
  0x37   : > { %1958 = vmatprep.subr.bf16.mxu1 %v2157_v49  ;;  %s316_s8 = scalar_lea.vmem %s2730_s3, %s1699_s5  ;;  %s1695_s11 = sshll.u32 %s282_s24, 6 }
  0x38   : > { %1181 = vmatmul.mubr.bf16.gmra.mrb[4].mxu0 %v2154_v46  ;;  %s284_s13 = scalar_lea.vmem [#allocation3], %s1695_s11  ;;  %s2681_s26 = scalar_lea.sflag [#allocation4], %s282_s24 }
  0x39   : > { %1246 = vmatmul.mubr.bf16.gmra.mrb[4].mxu1 %v2155_v47  ;;  %1919 = vmatpush3.bf16.msra.mxu0 %v2158_v50  ;;  %s1562_s14 = sshll.u32 %s284_s13, 4  ;;  %s2232_s5 = sshll.u32 %s2308_s30, 4  ;;  %s2677_s14 = int_to_ptr.vmem [resolvable:$true] %s1562_s14  ;;  %s2233_s5 = int_to_ptr.vmem [resolvable:$false] %s2232_s5 }
  0x3a   : > { %1959 = vmatpush3.bf16.msra.mxu1 %v2159_v51  ;;  %1920 = vmatprep.subr.bf16.mxu0 %v2160_v52  ;;  %s2228_s29 = scalar_lea.vmem %s2677_s14, 1024  ;;  %s2234_s6 = scalar_lea.vmem %s2233_s5, 2048 }
  0x3b   : > { %1960 = vmatprep.subr.bf16.mxu1 %v2161_v53  ;;  %1188 = vmatprep.mubr.bf16.mxu0 %v2164_v56  ;;  %p2229_p12 = scmp.ne.s32.totalorder %s2677_s14, %s2228_s29  ;;  %p2235_p1 = scmp.lt.s32.totalorder %s2677_s14, %s2233_s5 }
  0x3c   : > { %1253 = vmatprep.mubr.bf16.mxu1 %v2166_v57  ;;  %p2236_p2 = scmp.lt.s32.totalorder %s2234_s6, %s2228_s29 }
  0x3d   : > { %1921 = vmatpush3.bf16.msra.mxu0 %v2162_v54  ;;  %p2230_p13 = pnand %p2229_p12, %p2376_p4 }
  0x3e   : > { %1961 = vmatpush3.bf16.msra.mxu1 %v2163_v55  ;;  %1922 = vmatprep.subr.bf16.mxu0 %v2170_v60  ;;  %p2237_p3 = por %p2236_p2, %p2235_p1 }
  0x3f   : > { %1962 = vmatprep.subr.bf16.mxu1 %v2171_v61  ;;  %p2231_p0 = pneg %p2230_p13 }
  0x40   : > { %1189 = vmatmul.mubr.bf16.gmra.mrb[8].mxu0 %v2168_v58 }
  0x41   : > { %1254 = vmatmul.mubr.bf16.gmra.mrb[8].mxu1 %v2169_v59  ;;  %1923 = vmatpush3.bf16.msra.mxu0 %v2172_v62  ;;  %p2238_p5 = pnand %p2237_p3, %p2231_p0 }
  0x42   : > { %1963 = vmatpush3.bf16.msra.mxu1 %v2173_v63  ;;  %1924 = vmatprep.subr.bf16.mxu0 %v2174_v0 }
  0x43   : > { %1964 = vmatprep.subr.bf16.mxu1 %v2175_v1  ;;  %1196 = vmatprep.mubr.bf16.mxu0 %v2178_v4 }
  0x44   : > { %1261 = vmatprep.mubr.bf16.mxu1 %v2180_v5 }
  0x45   : > { %1925 = vmatpush3.bf16.msra.mxu0 %v2176_v2 }
  0x46   : > { %1965 = vmatpush3.bf16.msra.mxu1 %v2177_v3  ;;  %1926 = vmatprep.subr.bf16.mxu0 %v2184_v8 }
  0x47   : > { %1966 = vmatprep.subr.bf16.mxu1 %v2185_v9 }
  0x48   : > { %1197 = vmatmul.mubr.bf16.gmra.mrb[12].mxu0 %v2182_v6 }
  0x49   : > { %1262 = vmatmul.mubr.bf16.gmra.mrb[12].mxu1 %v2183_v7  ;;  %1927 = vmatpush3.bf16.msra.mxu0 %v2186_v10 }
  0x4a   : > { %1967 = vmatpush3.bf16.msra.mxu1 %v2187_v11  ;;  %1928 = vmatprep.subr.bf16.mxu0 %v2188_v12 }
  0x4b   : > { %1968 = vmatprep.subr.bf16.mxu1 %v2189_v13  ;;  %1302 = vmatprep.mubr.bf16.mxu0 %v2194_v17 }
  0x4c   : > { %1367 = vmatprep.mubr.bf16.mxu1 %v2197_v19 }
  0x4d   : > { %1929 = vmatpush3.bf16.msra.mxu0 %v2190_v14 }
  0x4e   : > { %1969 = vmatpush3.bf16.msra.mxu1 %v2191_v15  ;;  %2006 = vmatprep.subr.bf16.mxu0 %v2198_v20 }
  0x4f   : > { %2030 = vmatprep.subr.bf16.mxu1 %v2198_v20 }
  0x50   : > { %1303 = vmatmul.mubr.bf16.vlgmr.msra.gmra.mrb[16].mxu0 %v2192_v16 }
  0x51   : > { %1368 = vmatmul.mubr.bf16.vlgmr.msra.gmra.mrb[16].mxu1 %v2195_v18  ;;  %2007 = vmatpush3.bf16.msra.mxu0 %v2198_v20 }
  0x52   : > { %2038 = vmatpush3.bf16.msra.mxu1 %v2198_v20  ;;  %2008 = vmatprep.subr.bf16.mxu0 %v2199_v21 }
  0x53   : > { %2031 = vmatprep.subr.bf16.mxu1 %v2199_v21  ;;  %1310 = vmatprep.mubr.bf16.mxu0 %v2200_v22 }
  0x54   : > { %1375 = vmatprep.mubr.bf16.mxu1 %v2202_v23 }
  0x55   : > { %2009 = vmatpush3.bf16.msra.mxu0 %v2199_v21 }
  0x56   : > { %2039 = vmatpush3.bf16.msra.mxu1 %v2199_v21  ;;  %2010 = vmatprep.subr.bf16.mxu0 %v2206_v26 }
  0x57   : > { %2032 = vmatprep.subr.bf16.mxu1 %v2206_v26 }
  0x58   : > { %1311 = vmatmul.mubr.bf16.gmra.mrb[20].mxu0 %v2204_v24 }
  0x59   : > { %1376 = vmatmul.mubr.bf16.gmra.mrb[20].mxu1 %v2205_v25  ;;  %1318 = vmatprep.mubr.bf16.mxu0 %v2208_v27 }
  0x5a   : > { %2011 = vmatpush3.bf16.msra.mxu0 %v2206_v26  ;;  %1383 = vmatprep.mubr.bf16.mxu1 %v2210_v28 }
  0x5b   : > { %2040 = vmatpush3.bf16.msra.mxu1 %v2206_v26  ;;  %2012 = vmatprep.subr.bf16.mxu0 %v2207_v29 }
  0x5c   : > { %2033 = vmatprep.subr.bf16.mxu1 %v2207_v29 }
  0x5e   : > { %2013 = vmatpush3.bf16.msra.mxu0 %v2207_v29 }
  0x5f   : > { %2041 = vmatpush3.bf16.msra.mxu1 %v2207_v29  ;;  %2014 = vmatprep.subr.bf16.mxu0 %v2214_v32 }
  0x60   : > { %1319 = vmatmul.mubr.bf16.gmra.mrb[24].mxu0 %v2212_v30  ;;  %2034 = vmatprep.subr.bf16.mxu1 %v2214_v32 }
  0x61   : > { %1384 = vmatmul.mubr.bf16.gmra.mrb[24].mxu1 %v2213_v31  ;;  %1326 = vmatprep.mubr.bf16.mxu0 %v2216_v33 }
  0x62   : > { %2015 = vmatpush3.bf16.msra.mxu0 %v2214_v32  ;;  %1391 = vmatprep.mubr.bf16.mxu1 %v2218_v34 }
  0x63   : > { %2042 = vmatpush3.bf16.msra.mxu1 %v2214_v32  ;;  %2016 = vmatprep.subr.bf16.mxu0 %v2215_v35 }
  0x64   : > { %2035 = vmatprep.subr.bf16.mxu1 %v2215_v35 }
  0x66   : > { %2017 = vmatpush3.bf16.msra.mxu0 %v2215_v35 }
  0x67   : > { %2043 = vmatpush3.bf16.msra.mxu1 %v2215_v35  ;;  %2018 = vmatprep.subr.bf16.mxu0 %v2222_v37 }
  0x68   : > { %1327 = vmatmul.mubr.bf16.gmra.mrb[28].mxu0 %v2220_v36  ;;  %2036 = vmatprep.subr.bf16.mxu1 %v2222_v37 }
  0x69   : > { %1392 = vmatmul.mubr.bf16.gmra.mrb[28].mxu1 %v2221_v38  ;;  %2022 = vmatprep.mubr.bf16.mxu0 %v2224_v39 }
  0x6a   : > { %2019 = vmatpush3.bf16.msra.mxu0 %v2222_v37  ;;  %2026 = vmatprep.mubr.bf16.mxu1 %v2225_v40 }
  0x6b   : > { %2044 = vmatpush3.bf16.msra.mxu1 %v2222_v37  ;;  %2020 = vmatprep.subr.bf16.mxu0 %v2223_v41 }
  0x6c   : > { %2037 = vmatprep.subr.bf16.mxu1 %v2223_v41 }
  0x6e   : > { %2021 = vmatpush3.bf16.msra.mxu0 %v2223_v41 }
  0x6f   : > { %2045 = vmatpush3.bf16.msra.mxu1 %v2223_v41 }
  0x71   : > { %2023 = vmatmul.mubr.bf16.vlgmr.msra.gmra.mrb[32].mxu0 %v2226_v42 }
  0x72   : > { %2027 = vmatmul.mubr.bf16.vlgmr.msra.gmra.mrb[32].mxu1 %v2227_v43 }
 0x103   : > { %v1850_v44 = vpop.f32.mrb[0].mxu0 }
 0x104   : > { %v1890_v45 = vpop.f32.mrb[0].mxu1  ;;  %v1851_v46 = vpop.f32.mrb[1].mxu0 }
 0x105   : > { %v1852_v47 = vadd.f32 %v1851_v46, %v1850_v44  ;;  %v1891_v48 = vpop.f32.mrb[1].mxu1  ;;  %v1853_v49 = vpop.f32.mrb[2].mxu0 }
 0x106   : > { %v1892_v50 = vadd.f32 %v1891_v48, %v1890_v45  ;;  %v1893_v51 = vpop.f32.mrb[2].mxu1  ;;  %v1854_v52 = vpop.f32.mrb[3].mxu0 }
 0x107   : > { %v1855_v53 = vadd.f32 %v1854_v52, %v1853_v49  ;;  %v1894_v54 = vpop.f32.mrb[3].mxu1 }
 0x108   : > { %v1240_v55 = vadd.f32 %v1892_v50, %v1852_v47  ;;  %v1895_v56 = vadd.f32 %v1894_v54, %v1893_v51 }
 0x10a   : > { %v1243_v57 = vadd.f32 %v1895_v56, %v1855_v53 }
 0x10b   : > { %v1856_v58 = vpop.f32.mrb[4].mxu0 }
 0x10c   : > { %v1896_v59 = vpop.f32.mrb[4].mxu1  ;;  %v1857_v60 = vpop.f32.mrb[5].mxu0 }
 0x10d   : > { %v1858_v61 = vadd.f32 %v1857_v60, %v1856_v58  ;;  %v1897_v62 = vpop.f32.mrb[5].mxu1  ;;  %v1859_v63 = vpop.f32.mrb[6].mxu0 }
 0x10e   : > { %v1898_v0 = vadd.f32 %v1897_v62, %v1896_v59  ;;  %v1899_v1 = vpop.f32.mrb[6].mxu1  ;;  %v1860_v2 = vpop.f32.mrb[7].mxu0 }
 0x10f   : > { %v1861_v3 = vadd.f32 %v1860_v2, %v1859_v63  ;;  %v1900_v4 = vpop.f32.mrb[7].mxu1 }
 0x110   : > { %v1248_v5 = vadd.f32 %v1898_v0, %v1858_v61  ;;  %v1901_v6 = vadd.f32 %v1900_v4, %v1899_v1 }
 0x112   : > { %v1251_v7 = vadd.f32 %v1901_v6, %v1861_v3 }
 0x113   : > { %v1862_v8 = vpop.f32.mrb[8].mxu0 }
 0x114   : > { %v1902_v9 = vpop.f32.mrb[8].mxu1  ;;  %v1863_v10 = vpop.f32.mrb[9].mxu0 }
 0x115   : > { %v1864_v11 = vadd.f32 %v1863_v10, %v1862_v8  ;;  %v1903_v12 = vpop.f32.mrb[9].mxu1  ;;  %v1865_v13 = vpop.f32.mrb[10].mxu0 }
 0x116   : > { %v1904_v14 = vadd.f32 %v1903_v12, %v1902_v9  ;;  %v1905_v15 = vpop.f32.mrb[10].mxu1  ;;  %v1866_v16 = vpop.f32.mrb[11].mxu0 }
 0x117   : > { %v1867_v17 = vadd.f32 %v1866_v16, %v1865_v13  ;;  %v1906_v18 = vpop.f32.mrb[11].mxu1 }
 0x118   : > { %v1256_v19 = vadd.f32 %v1904_v14, %v1864_v11  ;;  %v1907_v20 = vadd.f32 %v1906_v18, %v1905_v15 }
 0x11a   : > { %v1259_v21 = vadd.f32 %v1907_v20, %v1867_v17 }
 0x11b   : > { %v1868_v22 = vpop.f32.mrb[12].mxu0 }
 0x11c   : > { %v1908_v23 = vpop.f32.mrb[12].mxu1  ;;  %v1869_v24 = vpop.f32.mrb[13].mxu0 }
 0x11d   : > { %v1909_v25 = vpop.f32.mrb[13].mxu1  ;;  %v1870_v26 = vadd.f32 %v1869_v24, %v1868_v22  ;;  %v1871_v28 = vpop.f32.mrb[14].mxu0 }
 0x11e   : > { %v1910_v27 = vadd.f32 %v1909_v25, %v1908_v23  ;;  %v1911_v29 = vpop.f32.mrb[14].mxu1  ;;  %v1872_v30 = vpop.f32.mrb[15].mxu0 }
 0x11f   : > { %v1912_v31 = vpop.f32.mrb[15].mxu1  ;;  %v1873_v33 = vadd.f32 %v1872_v30, %v1871_v28 }
 0x120   : > { %v1264_v32 = vadd.f32 %v1910_v27, %v1870_v26  ;;  %v1913_v34 = vadd.f32 %v1912_v31, %v1911_v29 }
 0x122   : > { %v2652_v35 = vadd.f32 %v1913_v34, %v1873_v33 }
 0x123   : > { %v1930_v36 = vpop.f32.mrb[16].mxu0 }
 0x124   : > { %v1931_v37 = vpop.f32.mrb[17].mxu0  ;;  %v1970_v38 = vpop.f32.mrb[16].mxu1 }
 0x125   : > { %v1932_v39 = vadd.f32 %v1931_v37, %v1930_v36  ;;  %v1933_v40 = vpop.f32.mrb[18].mxu0  ;;  %v1971_v41 = vpop.f32.mrb[17].mxu1  ;;  %v1831_v37 = vld [vmem:[%s316_s8 + $0x8] sm:$0xff]  }
 0x126   : > { %v1934_v42 = vpop.f32.mrb[19].mxu0  ;;  %v1972_v44 = vadd.f32 %v1971_v41, %v1970_v38  ;;  %v1973_v45 = vpop.f32.mrb[18].mxu1  ;;  %v1833_v38 = vld [vmem:[%s316_s8 + $0x18] sm:$0xff]  }
 0x127   : > { %v1305_v43 = vadd.f32 %v1932_v39, %v1240_v55  ;;  %v1935_v46 = vadd.f32 %v1934_v42, %v1933_v40  ;;  %v1974_v47 = vpop.f32.mrb[19].mxu1  ;;  %v1816_v39 = vld [vmem:[%s316_s8] sm:$0xff]   ;;  %v1832_v40 = vld [vmem:[%s316_s8 + $0x10] sm:$0xff]  }
 0x128   : > { %v1975_v49 = vadd.f32 %v1974_v47, %v1973_v45 }
 0x129   : > { %v1308_v48 = vadd.f32 %v1935_v46, %v1243_v57  ;;  %v2654_v50 = vadd.f32 %v1972_v44, %v1305_v43  ;;  %v1821_v43 = vunpack.c.l.bf16 %v1831_v37  ;;  %v1829_v44 = vunpack.c.l.bf16 %v1833_v38 }
 0x12b   : > { %v1936_v51 = vpop.f32.mrb[20].mxu0  ;;  %v2656_v52 = vadd.f32 %v1975_v49, %v1308_v48  ;;  %v1825_v48 = vunpack.c.l.bf16 %v1832_v40  ;;  %v1822_v49 = vunpack.c.h.bf16 %v1831_v37 }
 0x12c   : > { %v1937_v53 = vpop.f32.mrb[21].mxu0  ;;  %v1976_v54 = vpop.f32.mrb[20].mxu1 }
 0x12d   : > { %v1938_v56 = vadd.f32 %v1937_v53, %v1936_v51  ;;  %v1939_v58 = vpop.f32.mrb[22].mxu0  ;;  %v1977_v59 = vpop.f32.mrb[21].mxu1 }
 0x12e   : > { %v1940_v60 = vpop.f32.mrb[23].mxu0  ;;  %v1978_v62 = vadd.f32 %v1977_v59, %v1976_v54  ;;  %v1979_v55 = vpop.f32.mrb[22].mxu1  ;;  %v1818_v59 = vunpack.c.h.bf16 %v1816_v39 }
 0x12f   : > { %v1313_v61 = vadd.f32 %v1938_v56, %v1248_v5  ;;  %v1941_v63 = vadd.f32 %v1940_v60, %v1939_v58  ;;  %v1980_v0 = vpop.f32.mrb[23].mxu1  ;;  %v1830_v58 = vunpack.c.h.bf16 %v1833_v38 }
 0x130   : > { %v1981_v2 = vadd.f32 %v1980_v0, %v1979_v55  ;;  %v1826_v0 = vunpack.c.h.bf16 %v1832_v40 }
 0x131   : > { %v1316_v1 = vadd.f32 %v1941_v63, %v1251_v7  ;;  %v1378_v57 = vadd.f32 %v1978_v62, %v1313_v61 }
 0x133   : > { %v1942_v3 = vpop.f32.mrb[24].mxu0  ;;  %v1381_v4 = vadd.f32 %v1981_v2, %v1316_v1 }
 0x134   : > { %v1943_v6 = vpop.f32.mrb[25].mxu0  ;;  %v1982_v8 = vpop.f32.mrb[24].mxu1 }
 0x135   : > { %v1944_v9 = vadd.f32 %v1943_v6, %v1942_v3  ;;  %v1945_v10 = vpop.f32.mrb[26].mxu0  ;;  %v1983_v11 = vpop.f32.mrb[25].mxu1 }
 0x136   : > { %v1946_v12 = vpop.f32.mrb[27].mxu0  ;;  %v1984_v14 = vadd.f32 %v1983_v11, %v1982_v8  ;;  %v1985_v15 = vpop.f32.mrb[26].mxu1 }
 0x137   : > { %v1321_v13 = vadd.f32 %v1944_v9, %v1256_v19  ;;  %v1947_v5 = vadd.f32 %v1946_v12, %v1945_v10  ;;  %v1986_v16 = vpop.f32.mrb[27].mxu1 }
 0x138   : > { %v1987_v18 = vadd.f32 %v1986_v16, %v1985_v15 }
 0x139   : > { %v1324_v17 = vadd.f32 %v1947_v5, %v1259_v21  ;;  %v1386_v20 = vadd.f32 %v1984_v14, %v1321_v13 }
 0x13b   : > { %v1948_v7 = vpop.f32.mrb[28].mxu0  ;;  %v1389_v22 = vadd.f32 %v1987_v18, %v1324_v17 }
 0x13c   : > { %v1949_v23 = vpop.f32.mrb[29].mxu0  ;;  %v1988_v24 = vpop.f32.mrb[28].mxu1 }
 0x13d   : > { %v1950_v25 = vadd.f32 %v1949_v23, %v1948_v7  ;;  %v1951_v26 = vpop.f32.mrb[30].mxu0  ;;  %v1989_v27 = vpop.f32.mrb[29].mxu1 }
 0x13e   : > { %v1952_v28 = vpop.f32.mrb[31].mxu0  ;;  %v1990_v30 = vadd.f32 %v1989_v27, %v1988_v24  ;;  %v1991_v19 = vpop.f32.mrb[30].mxu1 }
 0x13f   : > { %v1329_v29 = vadd.f32 %v1950_v25, %v1264_v32  ;;  %v1953_v31 = vadd.f32 %v1952_v28, %v1951_v26  ;;  %v1992_v21 = vpop.f32.mrb[31].mxu1  ;;  %v1808_v32 = vld [vmem:[%s2729_s2] ss:$0 sm:$0xff] }
 0x140   : > { %v1993_v34 = vadd.f32 %v1992_v21, %v1991_v19 }
 0x141   : > { %v1332_v33 = vadd.f32 %v1953_v31, %v2652_v35  ;;  %v1394_v36 = vadd.f32 %v1990_v30, %v1329_v29  ;;  %v1817_v35 = vunpack.c.l.bf16 %v1816_v39 }
 0x143   : > { %v1397_v41 = vadd.f32 %v1993_v34, %v1332_v33 }
 0x144   : > { %v2024_v42 = vpop.f32.mrb[32].mxu0 }
 0x145   : > { %v1443_v45 = vadd.f32 %v2024_v42, %v1378_v57  ;;  %v2028_v46 = vpop.f32.mrb[32].mxu1  ;;  %v1434_v47 = vpop.f32.mrb[33].mxu0 }
 0x146   : > { %v1459_v51 = vadd.f32 %v2028_v46, %v1394_v36  ;;  %v1435_v53 = vadd.f32 %v1434_v47, %v2654_v50  ;;  %v1450_v54 = vpop.f32.mrb[33].mxu1  ;;  %v2025_v56 = vpop.f32.mrb[34].mxu0 }
 0x147   : > { %v1501_v60 = vadd.f32 %v1808_v32, %v1443_v45  ;;  %v1451_v61 = vadd.f32 %v1450_v54, %v1386_v20  ;;  %v1446_v62 = vadd.f32 %v2025_v56, %v1381_v4  ;;  %v2029_v55 = vpop.f32.mrb[34].mxu1  ;;  %v1437_v63 = vpop.f32.mrb[35].mxu0 }
 0x148   : > { %v1505_v1 = vadd.f32 %v1808_v32, %v1459_v51  ;;  %v1499_v2 = vadd.f32 %v1808_v32, %v1435_v53  ;;  %v1462_v57 = vadd.f32 %v2029_v55, %v1397_v41  ;;  %v1438_v3 = vadd.f32 %v1437_v63, %v2656_v52  ;;  %v1453_v6 = vpop.f32.mrb[35].mxu1 }
 0x149   : > { %v1525_v50 = vadd.f32 %v1821_v43, %v1501_v60  ;;  %v1503_v8 = vadd.f32 %v1808_v32, %v1451_v61  ;;  %v1502_v9 = vadd.f32 %v1808_v32, %v1446_v62  ;;  %v1454_v10 = vadd.f32 %v1453_v6, %v1389_v22 }
 0x14a   : > { %v1529_v11 = vadd.f32 %v1829_v44, %v1505_v1  ;;  %v1523_v12 = vadd.f32 %v1817_v35, %v1499_v2  ;;  %v1506_v13 = vadd.f32 %v1808_v32, %v1462_v57  ;;  %v1500_v14 = vadd.f32 %v1808_v32, %v1438_v3 }
 0x14b   : > { %v1533_v15 = vmax.f32 %v1525_v50, 0.0  ;;  %v1527_v4 = vadd.f32 %v1825_v48, %v1503_v8  ;;  %v1526_v5 = vadd.f32 %v1822_v49, %v1502_v9  ;;  %v1504_v16 = vadd.f32 %v1808_v32, %v1454_v10 }
 0x14c   : > { %v1537_v17 = vmax.f32 %v1529_v11, 0.0  ;;  %v1531_v18 = vmax.f32 %v1523_v12, 0.0  ;;  %v1530_v20 = vadd.f32 %v1830_v58, %v1506_v13  ;;  %v1524_v52 = vadd.f32 %v1818_v59, %v1500_v14 }
 0x14d   : > { %1541 = vst [vmem:[%s284_s13 + $0x10] sm:$0xff] %v1533_v15  ;;  %v1535_v7 = vmax.f32 %v1527_v4, 0.0  ;;  %v1534_v23 = vmax.f32 %v1526_v5, 0.0  ;;  %v1528_v22 = vadd.f32 %v1826_v0, %v1504_v16 }
 0x14e   : > { %1545 = vst [vmem:[%s284_s13 + $0x30] sm:$0xff] %v1537_v17  ;;  %1539 = vst [vmem:[%s284_s13] sm:$0xff] %v1531_v18  ;;  %v1538_v24 = vmax.f32 %v1530_v20, 0.0  ;;  %v1532_v25 = vmax.f32 %v1524_v52, 0.0 }
 0x14f   : > { %1543 = vst [vmem:[%s284_s13 + $0x20] sm:$0xff] %v1535_v7  ;;  %1542 = vst [vmem:[%s284_s13 + $0x18] sm:$0xff] %v1534_v23  ;;  %v1536_v26 = vmax.f32 %v1528_v22, 0.0 }
 0x150   : > { %1546 = vst [vmem:[%s284_s13 + $0x38] sm:$0xff] %v1538_v24  ;;  %1540 = vst [vmem:[%s284_s13 + $0x8] sm:$0xff] %v1532_v25 }
 0x151   : > { %1544 = vst [vmem:[%s284_s13 + $0x28] sm:$0xff] %v1536_v26 }
 0x152   : > { %2241 = shalt.err (!%p2238_p5)
}
 0x153   : > { %s2242_s7 = scalar_lea.hbm %s2675_s18, 1024  ;;  %s2246_s10 = scalar_lea.hbm %s2731_s4, 2048 }
 0x154   : > { %p2243_p6 = scmp.ne.s32.totalorder %s2675_s18, %s2242_s7  ;;  %p2247_p10 = scmp.lt.u32.totalorder %s2675_s18, %s2731_s4 }
 0x155   : > { %p2248_p11 = scmp.lt.u32.totalorder %s2246_s10, %s2242_s7  ;;  %p2250_p13 = scmp.lt.u32.totalorder %s2242_s7, %s2675_s18 }
 0x156   : > { %p2244_p7 = pnand %p2243_p6, %p2376_p4 }
 0x157   : > { %p2249_p12 = por %p2248_p11, %p2247_p10 }
 0x158   : > { %p2245_p9 = pneg %p2244_p7 }
 0x159   : > { %p2251_p0 = por %p2250_p13, %p2249_p12 }
 0x15b   : > { %p2252_p1 = pnand %p2251_p0, %p2245_p9 }
 0x15d   : > { %2255 = shalt.err (!%p2252_p1)
}
 0x15e   : > { %s2309_s12 = smov 128   ;;  %s2310_s13 = smov 8  }
 0x15f   : > { %2047 = dma.vmem_to_hbm [thread:$0]  (%p2376_p4), %s2677_s14, 1024, %s2675_s18, %s2681_s26, %s2309_s12, %s2309_s12, %s2310_s13  }
 0x160 PF: > { %p2053_p2 = scmp.ge.s32.totalorder %s2306_s20, 2  ;;  %s1577_s21 = sand.u32 1, %s2286_s15  }
 0x161   : > { %s1578_s22 = scalar_lea.sflag [#allocation4], %s1577_s21 }
 0x162   : > { %p2050_p3 = pnand %p2053_p2, %p2383_p8 }
 0x164   : > { %2281 = dma.done.wait (!%p2050_p3), %s1578_s22, 1024  }
 0x165   : > { %2283 = vsyncadd (!%p2050_p3), %s1578_s22, 4294966272  ;;  %s17_s20 = sadd.s32 1, %s2306_s20   ;;  %s2734_s15 = smov %s2290_s16 }
 0x166   : > { %p14_p5 = scmp.ge.s32.totalorder %s17_s20, 4   ;;  %s2735_s16 = smov %s2294_s17 }
 0x167   : > { %s2736_s17 = smov %s2389_s28  ;;  %s2737_s18 = smov %s2302_s19 }
 0x168   : > { %s2738_s19 = smov %s2740_s23  ;;  %16 = sbr.rel (!%p14_p5) target bundleno = 4 (0x4), region = 88 }
 0x16f   :  { %1583 = vsyncpa [#allocation4], 1 }
 0x170   :  { %1585 = vsyncpa [#allocation4 + $0x1], 1 }

</bundles_post_ra>
